<compile_context>
chip_gen: v5e
topology: v5e:2x2
jax: 0.10.0
libtpu: 0.0.40
codegen_flags: <defaults>
</compile_context>

<pallas_src>
import jax
import jax.numpy as jnp
from jax.experimental import pallas as pl
from jax.experimental.pallas import tpu as pltpu

# ----------------------------- model dims ---------------------------------
N_BATCH = 2
H_IN = W_IN = 28
KSIZE = 5
K_TAPS = KSIZE * KSIZE              # 25
K_PAD = 32                          # zero-padded conv contraction dim
OH = OW = H_IN - KSIZE + 1          # 24
C_OUT = 32
PH = PW = OH // 2                   # 12
POS = PH * PW                       # 144 pooled positions per image
POS_PAD = 256                       # lane-aligned per-group slab width
FLAT = C_OUT * POS                  # 4608
HID = 128
NCLASS = 10
N_GROUPS = 4                        # the 2x2 pool-window offsets


# ----------------------------- fused Pallas kernel -------------------------
def fused_cnn_kernel(p_ref, wc_ref, bc_ref, w1_ref, b1_ref, w2_ref, b2_ref, o_ref):
    """Fused conv(im2col) + ReLU + maxpool + fc1 + ReLU + fc2 + log_softmax.

    p_ref : (N*K_PAD, 4*POS_PAD) bf16  im2col patches; rows = n*K_PAD + k,
                                       cols = g*POS_PAD + pos (pos = ph*12 + pw).
    wc_ref: (C_OUT*N, N*K_PAD)  bf16   block-diagonal conv weight; rows = c*N + n.
    bc_ref: (C_OUT*N, 1)        f32    conv bias replicated per (c, n) row.
    w1_ref: (C_OUT, POS, HID)   bf16   fc1 weight, channel-major chunks.
    b1_ref: (1, HID)            f32
    w2_ref: (HID, NCLASS)       bf16
    b2_ref: (1, NCLASS)         f32
    o_ref : (N, NCLASS)         f32
    """
    # One MXU dot covers all 4 pool-window offsets (groups lane-concatenated).
    z = jnp.dot(wc_ref[...], p_ref[...],
                preferred_element_type=jnp.float32)          # (64, 1024) f32

    # MaxPool(2,2): element-wise max over the four 256-lane, vreg-aligned slabs.
    zm = jnp.maximum(jnp.maximum(z[:, 0:POS_PAD], z[:, POS_PAD:2 * POS_PAD]),
                     jnp.maximum(z[:, 2 * POS_PAD:3 * POS_PAD],
                                 z[:, 3 * POS_PAD:4 * POS_PAD]))
    # Bias + ReLU (ReLU commutes with max); drop the padded lanes (>=144) which the
    # zero patch columns turned into bias-only garbage.
    pooled = jnp.maximum(zm + bc_ref[...], 0.0)[:, :POS]     # (64, 144), rows = c*N+n

    # fc1: h[n, j] = sum_{c, pos} pooled[c*N + n, pos] * w1[c, pos, j]
    # 32 per-channel MXU dots (bf16 operands, f32 accum) summed with a balanced
    # tree to avoid a 32-deep dependent add chain.
    parts = []
    for c in range(C_OUT):
        lhs = pooled[c * N_BATCH:(c + 1) * N_BATCH, :].astype(jnp.bfloat16)  # (N, POS)
        parts.append(jnp.dot(lhs, w1_ref[c], preferred_element_type=jnp.float32))
    while len(parts) > 1:
        nxt = []
        for i in range(0, len(parts), 2):
            if i + 1 < len(parts):
                nxt.append(parts[i] + parts[i + 1])
            else:
                nxt.append(parts[i])
        parts = nxt
    h = jnp.maximum(parts[0] + b1_ref[...], 0.0)              # (N, HID) f32

    logits = jnp.dot(h.astype(jnp.bfloat16), w2_ref[...],
                     preferred_element_type=jnp.float32) + b2_ref[...]   # (N, NCLASS)
    m = jnp.max(logits, axis=-1, keepdims=True)
    lse = m + jnp.log(jnp.sum(jnp.exp(logits - m), axis=-1, keepdims=True))
    o_ref[...] = logits - lse


_VMEM = pl.BlockSpec(memory_space=pltpu.MemorySpace.VMEM)


# ----------------------------- host-side glue ------------------------------
def _build_patches(x):
    """(N,1,28,28) -> (N*K_PAD, 4*POS_PAD) bf16 patches, pool-grouped and padded.

    One conv_general_dilated_patches call replaces the previous ~100-op im2col.
    """
    pf = jax.lax.conv_general_dilated_patches(
        x, filter_shape=(KSIZE, KSIZE), window_strides=(1, 1), padding="VALID",
        dimension_numbers=("NCHW", "OIHW", "NCHW"))           # (N, 25, 24, 24)
    pf = pf.reshape(N_BATCH, K_TAPS, PH, 2, PW, 2)            # [n,k,ph,wh,pw,ww]
    pf = pf.transpose(3, 5, 0, 1, 2, 4)                       # [wh,ww,n,k,ph,pw]
    pf = pf.reshape(N_GROUPS, N_BATCH, K_TAPS, POS)           # (4, N, 25, 144)
    pf = jnp.pad(pf, ((0, 0), (0, 0), (0, K_PAD - K_TAPS), (0, POS_PAD - POS)))
    p_all = pf.transpose(1, 2, 0, 3).reshape(N_BATCH * K_PAD, N_GROUPS * POS_PAD)
    return p_all.astype(jnp.bfloat16)                         # (64, 1024)


def pack_params(params):
    """One-time repack of PyTorch-layout parameters into kernel layouts (bf16)."""
    conv_w, conv_b, fc1_w, fc1_b, fc2_w, fc2_b = params
    wc = conv_w.reshape(C_OUT, K_TAPS)
    wc = jnp.pad(wc, ((0, 0), (0, K_PAD - K_TAPS)))                   # (32, 32)
    # Block-diagonal over the batch so one dot yields rows ordered (c, n).
    wc_blk = jnp.zeros((C_OUT * N_BATCH, N_BATCH * K_PAD), jnp.float32)
    for n in range(N_BATCH):
        wc_blk = wc_blk.at[n::N_BATCH, n * K_PAD:(n + 1) * K_PAD].set(wc)
    bc_blk = jnp.repeat(conv_b, N_BATCH).reshape(C_OUT * N_BATCH, 1)  # f32
    w1r = fc1_w.T.reshape(C_OUT, POS, HID)                            # (32, 144, 128)
    b1 = fc1_b.reshape(1, HID)                                        # f32
    w2m = fc2_w.T                                                     # (128, 10)
    b2 = fc2_b.reshape(1, NCLASS)                                     # f32
    return (wc_blk.astype(jnp.bfloat16), bc_blk,
            w1r.astype(jnp.bfloat16), b1,
            w2m.astype(jnp.bfloat16), b2)


_COST = pl.CostEstimate(
    flops=int(2 * (C_OUT * N_BATCH) * (N_BATCH * K_PAD) * (N_GROUPS * POS_PAD)
              + 2 * C_OUT * N_BATCH * POS * HID
              + 2 * N_BATCH * HID * NCLASS),
    transcendentals=N_BATCH * (NCLASS + 1),
    bytes_accessed=int(N_BATCH * K_PAD * N_GROUPS * POS_PAD * 2      # patches bf16
                       + (C_OUT * N_BATCH) * (N_BATCH * K_PAD) * 2   # conv weight
                       + C_OUT * POS * HID * 2                       # fc1 weight
                       + HID * NCLASS * 2                            # fc2 weight
                       + (C_OUT * N_BATCH + HID + NCLASS) * 4        # biases
                       + N_BATCH * NCLASS * 4))                      # output


@jax.jit
def basic_cnn_forward(x, packed):
    wc_blk, bc_blk, w1r, b1, w2m, b2 = packed
    patches = _build_patches(x)
    return pl.pallas_call(
        fused_cnn_kernel,
        out_shape=jax.ShapeDtypeStruct((N_BATCH, NCLASS), jnp.float32),
        in_specs=[_VMEM] * 7,
        out_specs=_VMEM,
        cost_estimate=_COST,
        compiler_params=pltpu.CompilerParams(vmem_limit_bytes=8 * 1024 * 1024),
    )(patches, wc_blk, bc_blk, w1r, b1, w2m, b2)


# ----------------------------- reference (pure JAX, PyTorch semantics) ------
def reference_forward(x, params):
    conv_w, conv_b, fc1_w, fc1_b, fc2_w, fc2_b = params
    hi = jax.lax.Precision.HIGHEST
    y = jax.lax.conv_general_dilated(
        x, conv_w, window_strides=(1, 1), padding="VALID",
        dimension_numbers=("NCHW", "OIHW", "NCHW"), precision=hi)
    y = jnp.maximum(y + conv_b[None, :, None, None], 0.0)            # (N,32,24,24)
    y = y.reshape(N_BATCH, C_OUT, PH, 2, PW, 2).max(axis=(3, 5))     # (N,32,12,12)
    flat = y.reshape(N_BATCH, FLAT)                                  # channel-major
    h = jnp.maximum(jnp.dot(flat, fc1_w.T, precision=hi) + fc1_b, 0.0)
    logits = jnp.dot(h, fc2_w.T, precision=hi) + fc2_b
    return jax.nn.log_softmax(logits, axis=1)


# ----------------------------- main -----------------------------------------
if __name__ == "__main__":
    key = jax.random.PRNGKey(0)
    kx, kwc, kbc, kw1, kb1, kw2, kb2 = jax.random.split(key, 7)

    # Parameters in PyTorch layouts (conv1.weight (32,1,5,5), fc1.weight (128,4608), ...).
    conv_w = jax.random.normal(kwc, (C_OUT, 1, KSIZE, KSIZE), jnp.float32) * 0.1
    conv_b = jax.random.normal(kbc, (C_OUT,), jnp.float32) * 0.01
    fc1_w = jax.random.normal(kw1, (HID, FLAT), jnp.float32) * 0.02
    fc1_b = jax.random.normal(kb1, (HID,), jnp.float32) * 0.01
    fc2_w = jax.random.normal(kw2, (NCLASS, HID), jnp.float32) * 0.05
    fc2_b = jax.random.normal(kb2, (NCLASS,), jnp.float32) * 0.01
    params = (conv_w, conv_b, fc1_w, fc1_b, fc2_w, fc2_b)

    # Input: NCHW, single channel, 28x28 (required by the 32*12*12 flatten size).
    x = jax.random.normal(kx, (N_BATCH, 1, H_IN, W_IN), jnp.float32)

    packed = pack_params(params)
    out = jax.block_until_ready(basic_cnn_forward(x, packed))
    ref = jax.block_until_ready(reference_forward(x, params))

    assert out.shape == (N_BATCH, NCLASS), out.shape
    # bf16 weight/patch storage (f32 accumulation) -> tolerance relaxed vs the pure-f32
    # reference; observed error is dominated by bf16 rounding of the 4608-term fc1 sum.
    assert jnp.allclose(out, ref, atol=2e-2, rtol=2e-2), (
        "mismatch vs reference: max abs err "
        f"{jnp.max(jnp.abs(out - ref))}")
    print("KERNEL_OK")
</pallas_src>

<mosaic_0001>
module attributes {stable_mosaic.version = 11 : i64} {
  func.func @fused_cnn_kernel(%arg0: memref<64x1024xbf16, #tpu.memory_space<vmem>>, %arg1: memref<64x64xbf16, #tpu.memory_space<vmem>>, %arg2: memref<64x1xf32, #tpu.memory_space<vmem>>, %arg3: memref<32x144x128xbf16, #tpu.memory_space<vmem>>, %arg4: memref<1x128xf32, #tpu.memory_space<vmem>>, %arg5: memref<128x10xbf16, #tpu.memory_space<vmem>>, %arg6: memref<1x10xf32, #tpu.memory_space<vmem>>, %arg7: memref<2x10xf32, #tpu.memory_space<vmem>>) attributes {dimension_semantics = [], scalar_prefetch = 0 : i64, scratch_operands = 0 : i64, tpu.core_type = #tpu.core_type<tc>} {
    %c0 = arith.constant 0 : index
    %c0_0 = arith.constant 0 : index
    %0 = vector.load %arg1[%c0, %c0_0] : memref<64x64xbf16, #tpu.memory_space<vmem>>, vector<64x64xbf16>
    %c0_1 = arith.constant 0 : index
    %c0_2 = arith.constant 0 : index
    %1 = vector.load %arg0[%c0_1, %c0_2] : memref<64x1024xbf16, #tpu.memory_space<vmem>>, vector<64x1024xbf16>
    %cst = arith.constant dense<0.000000e+00> : vector<64x1024xf32>
    %2 = tpu.matmul %0, %1, %cst {dimension_numbers = #tpu.dot_dimension_numbers<[1], [0], [0], [1], [0, 0, 1, 1], [], []>} : vector<64x64xbf16>, vector<64x1024xbf16>, vector<64x1024xf32> -> vector<64x1024xf32>
    %3 = vector.extract_strided_slice %2 {offsets = [0, 0], sizes = [64, 256], strides = [1, 1]} : vector<64x1024xf32> to vector<64x256xf32>
    %4 = vector.extract_strided_slice %2 {offsets = [0, 256], sizes = [64, 256], strides = [1, 1]} : vector<64x1024xf32> to vector<64x256xf32>
    %5 = arith.maximumf %3, %4 : vector<64x256xf32>
    %6 = vector.extract_strided_slice %2 {offsets = [0, 512], sizes = [64, 256], strides = [1, 1]} : vector<64x1024xf32> to vector<64x256xf32>
    %7 = vector.extract_strided_slice %2 {offsets = [0, 768], sizes = [64, 256], strides = [1, 1]} : vector<64x1024xf32> to vector<64x256xf32>
    %8 = arith.maximumf %6, %7 : vector<64x256xf32>
    %9 = arith.maximumf %5, %8 : vector<64x256xf32>
    %c0_3 = arith.constant 0 : index
    %c0_4 = arith.constant 0 : index
    %10 = vector.load %arg2[%c0_3, %c0_4] : memref<64x1xf32, #tpu.memory_space<vmem>>, vector<64x1xf32>
    %11 = vector.broadcast %10 : vector<64x1xf32> to vector<64x256xf32>
    %12 = arith.addf %9, %11 : vector<64x256xf32>
    %cst_5 = arith.constant 0.000000e+00 : f32
    %13 = vector.broadcast %cst_5 : f32 to vector<64x256xf32>
    %14 = arith.maximumf %12, %13 : vector<64x256xf32>
    %15 = vector.extract_strided_slice %14 {offsets = [0, 0], sizes = [64, 144], strides = [1, 1]} : vector<64x256xf32> to vector<64x144xf32>
    %16 = vector.extract_strided_slice %15 {offsets = [0, 0], sizes = [2, 144], strides = [1, 1]} : vector<64x144xf32> to vector<2x144xf32>
    %17 = arith.truncf %16 : vector<2x144xf32> to vector<2x144xbf16>
    %c0_6 = arith.constant 0 : index
    %c0_7 = arith.constant 0 : index
    %c0_8 = arith.constant 0 : index
    %18 = vector.load %arg3[%c0_6, %c0_7, %c0_8] : memref<32x144x128xbf16, #tpu.memory_space<vmem>>, vector<1x144x128xbf16>
    %19 = vector.shape_cast %18 : vector<1x144x128xbf16> to vector<144x128xbf16>
    %cst_9 = arith.constant dense<0.000000e+00> : vector<2x128xf32>
    %20 = tpu.matmul %17, %19, %cst_9 {dimension_numbers = #tpu.dot_dimension_numbers<[1], [0], [0], [1], [0, 0, 1, 1], [], []>} : vector<2x144xbf16>, vector<144x128xbf16>, vector<2x128xf32> -> vector<2x128xf32>
    %21 = vector.extract_strided_slice %15 {offsets = [2, 0], sizes = [2, 144], strides = [1, 1]} : vector<64x144xf32> to vector<2x144xf32>
    %22 = arith.truncf %21 : vector<2x144xf32> to vector<2x144xbf16>
    %c1 = arith.constant 1 : index
    %c0_10 = arith.constant 0 : index
    %c0_11 = arith.constant 0 : index
    %23 = vector.load %arg3[%c1, %c0_10, %c0_11] : memref<32x144x128xbf16, #tpu.memory_space<vmem>>, vector<1x144x128xbf16>
    %24 = vector.shape_cast %23 : vector<1x144x128xbf16> to vector<144x128xbf16>
    %cst_12 = arith.constant dense<0.000000e+00> : vector<2x128xf32>
    %25 = tpu.matmul %22, %24, %cst_12 {dimension_numbers = #tpu.dot_dimension_numbers<[1], [0], [0], [1], [0, 0, 1, 1], [], []>} : vector<2x144xbf16>, vector<144x128xbf16>, vector<2x128xf32> -> vector<2x128xf32>
    %26 = vector.extract_strided_slice %15 {offsets = [4, 0], sizes = [2, 144], strides = [1, 1]} : vector<64x144xf32> to vector<2x144xf32>
    %27 = arith.truncf %26 : vector<2x144xf32> to vector<2x144xbf16>
    %c2 = arith.constant 2 : index
    %c0_13 = arith.constant 0 : index
    %c0_14 = arith.constant 0 : index
    %28 = vector.load %arg3[%c2, %c0_13, %c0_14] : memref<32x144x128xbf16, #tpu.memory_space<vmem>>, vector<1x144x128xbf16>
    %29 = vector.shape_cast %28 : vector<1x144x128xbf16> to vector<144x128xbf16>
    %cst_15 = arith.constant dense<0.000000e+00> : vector<2x128xf32>
    %30 = tpu.matmul %27, %29, %cst_15 {dimension_numbers = #tpu.dot_dimension_numbers<[1], [0], [0], [1], [0, 0, 1, 1], [], []>} : vector<2x144xbf16>, vector<144x128xbf16>, vector<2x128xf32> -> vector<2x128xf32>
    %31 = vector.extract_strided_slice %15 {offsets = [6, 0], sizes = [2, 144], strides = [1, 1]} : vector<64x144xf32> to vector<2x144xf32>
    %32 = arith.truncf %31 : vector<2x144xf32> to vector<2x144xbf16>
    %c3 = arith.constant 3 : index
    %c0_16 = arith.constant 0 : index
    %c0_17 = arith.constant 0 : index
    %33 = vector.load %arg3[%c3, %c0_16, %c0_17] : memref<32x144x128xbf16, #tpu.memory_space<vmem>>, vector<1x144x128xbf16>
    %34 = vector.shape_cast %33 : vector<1x144x128xbf16> to vector<144x128xbf16>
    %cst_18 = arith.constant dense<0.000000e+00> : vector<2x128xf32>
    %35 = tpu.matmul %32, %34, %cst_18 {dimension_numbers = #tpu.dot_dimension_numbers<[1], [0], [0], [1], [0, 0, 1, 1], [], []>} : vector<2x144xbf16>, vector<144x128xbf16>, vector<2x128xf32> -> vector<2x128xf32>
    %36 = vector.extract_strided_slice %15 {offsets = [8, 0], sizes = [2, 144], strides = [1, 1]} : vector<64x144xf32> to vector<2x144xf32>
    %37 = arith.truncf %36 : vector<2x144xf32> to vector<2x144xbf16>
    %c4 = arith.constant 4 : index
    %c0_19 = arith.constant 0 : index
    %c0_20 = arith.constant 0 : index
    %38 = vector.load %arg3[%c4, %c0_19, %c0_20] : memref<32x144x128xbf16, #tpu.memory_space<vmem>>, vector<1x144x128xbf16>
    %39 = vector.shape_cast %38 : vector<1x144x128xbf16> to vector<144x128xbf16>
    %cst_21 = arith.constant dense<0.000000e+00> : vector<2x128xf32>
    %40 = tpu.matmul %37, %39, %cst_21 {dimension_numbers = #tpu.dot_dimension_numbers<[1], [0], [0], [1], [0, 0, 1, 1], [], []>} : vector<2x144xbf16>, vector<144x128xbf16>, vector<2x128xf32> -> vector<2x128xf32>
    %41 = vector.extract_strided_slice %15 {offsets = [10, 0], sizes = [2, 144], strides = [1, 1]} : vector<64x144xf32> to vector<2x144xf32>
    %42 = arith.truncf %41 : vector<2x144xf32> to vector<2x144xbf16>
    %c5 = arith.constant 5 : index
    %c0_22 = arith.constant 0 : index
    %c0_23 = arith.constant 0 : index
    %43 = vector.load %arg3[%c5, %c0_22, %c0_23] : memref<32x144x128xbf16, #tpu.memory_space<vmem>>, vector<1x144x128xbf16>
    %44 = vector.shape_cast %43 : vector<1x144x128xbf16> to vector<144x128xbf16>
    %cst_24 = arith.constant dense<0.000000e+00> : vector<2x128xf32>
    %45 = tpu.matmul %42, %44, %cst_24 {dimension_numbers = #tpu.dot_dimension_numbers<[1], [0], [0], [1], [0, 0, 1, 1], [], []>} : vector<2x144xbf16>, vector<144x128xbf16>, vector<2x128xf32> -> vector<2x128xf32>
    %46 = vector.extract_strided_slice %15 {offsets = [12, 0], sizes = [2, 144], strides = [1, 1]} : vector<64x144xf32> to vector<2x144xf32>
    %47 = arith.truncf %46 : vector<2x144xf32> to vector<2x144xbf16>
    %c6 = arith.constant 6 : index
    %c0_25 = arith.constant 0 : index
    %c0_26 = arith.constant 0 : index
    %48 = vector.load %arg3[%c6, %c0_25, %c0_26] : memref<32x144x128xbf16, #tpu.memory_space<vmem>>, vector<1x144x128xbf16>
    %49 = vector.shape_cast %48 : vector<1x144x128xbf16> to vector<144x128xbf16>
    %cst_27 = arith.constant dense<0.000000e+00> : vector<2x128xf32>
    %50 = tpu.matmul %47, %49, %cst_27 {dimension_numbers = #tpu.dot_dimension_numbers<[1], [0], [0], [1], [0, 0, 1, 1], [], []>} : vector<2x144xbf16>, vector<144x128xbf16>, vector<2x128xf32> -> vector<2x128xf32>
    %51 = vector.extract_strided_slice %15 {offsets = [14, 0], sizes = [2, 144], strides = [1, 1]} : vector<64x144xf32> to vector<2x144xf32>
    %52 = arith.truncf %51 : vector<2x144xf32> to vector<2x144xbf16>
    %c7 = arith.constant 7 : index
    %c0_28 = arith.constant 0 : index
    %c0_29 = arith.constant 0 : index
    %53 = vector.load %arg3[%c7, %c0_28, %c0_29] : memref<32x144x128xbf16, #tpu.memory_space<vmem>>, vector<1x144x128xbf16>
    %54 = vector.shape_cast %53 : vector<1x144x128xbf16> to vector<144x128xbf16>
    %cst_30 = arith.constant dense<0.000000e+00> : vector<2x128xf32>
    %55 = tpu.matmul %52, %54, %cst_30 {dimension_numbers = #tpu.dot_dimension_numbers<[1], [0], [0], [1], [0, 0, 1, 1], [], []>} : vector<2x144xbf16>, vector<144x128xbf16>, vector<2x128xf32> -> vector<2x128xf32>
    %56 = vector.extract_strided_slice %15 {offsets = [16, 0], sizes = [2, 144], strides = [1, 1]} : vector<64x144xf32> to vector<2x144xf32>
    %57 = arith.truncf %56 : vector<2x144xf32> to vector<2x144xbf16>
    %c8 = arith.constant 8 : index
    %c0_31 = arith.constant 0 : index
    %c0_32 = arith.constant 0 : index
    %58 = vector.load %arg3[%c8, %c0_31, %c0_32] : memref<32x144x128xbf16, #tpu.memory_space<vmem>>, vector<1x144x128xbf16>
    %59 = vector.shape_cast %58 : vector<1x144x128xbf16> to vector<144x128xbf16>
    %cst_33 = arith.constant dense<0.000000e+00> : vector<2x128xf32>
    %60 = tpu.matmul %57, %59, %cst_33 {dimension_numbers = #tpu.dot_dimension_numbers<[1], [0], [0], [1], [0, 0, 1, 1], [], []>} : vector<2x144xbf16>, vector<144x128xbf16>, vector<2x128xf32> -> vector<2x128xf32>
    %61 = vector.extract_strided_slice %15 {offsets = [18, 0], sizes = [2, 144], strides = [1, 1]} : vector<64x144xf32> to vector<2x144xf32>
    %62 = arith.truncf %61 : vector<2x144xf32> to vector<2x144xbf16>
    %c9 = arith.constant 9 : index
    %c0_34 = arith.constant 0 : index
    %c0_35 = arith.constant 0 : index
    %63 = vector.load %arg3[%c9, %c0_34, %c0_35] : memref<32x144x128xbf16, #tpu.memory_space<vmem>>, vector<1x144x128xbf16>
    %64 = vector.shape_cast %63 : vector<1x144x128xbf16> to vector<144x128xbf16>
    %cst_36 = arith.constant dense<0.000000e+00> : vector<2x128xf32>
    %65 = tpu.matmul %62, %64, %cst_36 {dimension_numbers = #tpu.dot_dimension_numbers<[1], [0], [0], [1], [0, 0, 1, 1], [], []>} : vector<2x144xbf16>, vector<144x128xbf16>, vector<2x128xf32> -> vector<2x128xf32>
    %66 = vector.extract_strided_slice %15 {offsets = [20, 0], sizes = [2, 144], strides = [1, 1]} : vector<64x144xf32> to vector<2x144xf32>
    %67 = arith.truncf %66 : vector<2x144xf32> to vector<2x144xbf16>
    %c10 = arith.constant 10 : index
    %c0_37 = arith.constant 0 : index
    %c0_38 = arith.constant 0 : index
    %68 = vector.load %arg3[%c10, %c0_37, %c0_38] : memref<32x144x128xbf16, #tpu.memory_space<vmem>>, vector<1x144x128xbf16>
    %69 = vector.shape_cast %68 : vector<1x144x128xbf16> to vector<144x128xbf16>
    %cst_39 = arith.constant dense<0.000000e+00> : vector<2x128xf32>
    %70 = tpu.matmul %67, %69, %cst_39 {dimension_numbers = #tpu.dot_dimension_numbers<[1], [0], [0], [1], [0, 0, 1, 1], [], []>} : vector<2x144xbf16>, vector<144x128xbf16>, vector<2x128xf32> -> vector<2x128xf32>
    %71 = vector.extract_strided_slice %15 {offsets = [22, 0], sizes = [2, 144], strides = [1, 1]} : vector<64x144xf32> to vector<2x144xf32>
    %72 = arith.truncf %71 : vector<2x144xf32> to vector<2x144xbf16>
    %c11 = arith.constant 11 : index
    %c0_40 = arith.constant 0 : index
    %c0_41 = arith.constant 0 : index
    %73 = vector.load %arg3[%c11, %c0_40, %c0_41] : memref<32x144x128xbf16, #tpu.memory_space<vmem>>, vector<1x144x128xbf16>
    %74 = vector.shape_cast %73 : vector<1x144x128xbf16> to vector<144x128xbf16>
    %cst_42 = arith.constant dense<0.000000e+00> : vector<2x128xf32>
    %75 = tpu.matmul %72, %74, %cst_42 {dimension_numbers = #tpu.dot_dimension_numbers<[1], [0], [0], [1], [0, 0, 1, 1], [], []>} : vector<2x144xbf16>, vector<144x128xbf16>, vector<2x128xf32> -> vector<2x128xf32>
    %76 = vector.extract_strided_slice %15 {offsets = [24, 0], sizes = [2, 144], strides = [1, 1]} : vector<64x144xf32> to vector<2x144xf32>
    %77 = arith.truncf %76 : vector<2x144xf32> to vector<2x144xbf16>
    %c12 = arith.constant 12 : index
    %c0_43 = arith.constant 0 : index
    %c0_44 = arith.constant 0 : index
    %78 = vector.load %arg3[%c12, %c0_43, %c0_44] : memref<32x144x128xbf16, #tpu.memory_space<vmem>>, vector<1x144x128xbf16>
    %79 = vector.shape_cast %78 : vector<1x144x128xbf16> to vector<144x128xbf16>
    %cst_45 = arith.constant dense<0.000000e+00> : vector<2x128xf32>
    %80 = tpu.matmul %77, %79, %cst_45 {dimension_numbers = #tpu.dot_dimension_numbers<[1], [0], [0], [1], [0, 0, 1, 1], [], []>} : vector<2x144xbf16>, vector<144x128xbf16>, vector<2x128xf32> -> vector<2x128xf32>
    %81 = vector.extract_strided_slice %15 {offsets = [26, 0], sizes = [2, 144], strides = [1, 1]} : vector<64x144xf32> to vector<2x144xf32>
    %82 = arith.truncf %81 : vector<2x144xf32> to vector<2x144xbf16>
    %c13 = arith.constant 13 : index
    %c0_46 = arith.constant 0 : index
    %c0_47 = arith.constant 0 : index
    %83 = vector.load %arg3[%c13, %c0_46, %c0_47] : memref<32x144x128xbf16, #tpu.memory_space<vmem>>, vector<1x144x128xbf16>
    %84 = vector.shape_cast %83 : vector<1x144x128xbf16> to vector<144x128xbf16>
    %cst_48 = arith.constant dense<0.000000e+00> : vector<2x128xf32>
    %85 = tpu.matmul %82, %84, %cst_48 {dimension_numbers = #tpu.dot_dimension_numbers<[1], [0], [0], [1], [0, 0, 1, 1], [], []>} : vector<2x144xbf16>, vector<144x128xbf16>, vector<2x128xf32> -> vector<2x128xf32>
    %86 = vector.extract_strided_slice %15 {offsets = [28, 0], sizes = [2, 144], strides = [1, 1]} : vector<64x144xf32> to vector<2x144xf32>
    %87 = arith.truncf %86 : vector<2x144xf32> to vector<2x144xbf16>
    %c14 = arith.constant 14 : index
    %c0_49 = arith.constant 0 : index
    %c0_50 = arith.constant 0 : index
    %88 = vector.load %arg3[%c14, %c0_49, %c0_50] : memref<32x144x128xbf16, #tpu.memory_space<vmem>>, vector<1x144x128xbf16>
    %89 = vector.shape_cast %88 : vector<1x144x128xbf16> to vector<144x128xbf16>
    %cst_51 = arith.constant dense<0.000000e+00> : vector<2x128xf32>
    %90 = tpu.matmul %87, %89, %cst_51 {dimension_numbers = #tpu.dot_dimension_numbers<[1], [0], [0], [1], [0, 0, 1, 1], [], []>} : vector<2x144xbf16>, vector<144x128xbf16>, vector<2x128xf32> -> vector<2x128xf32>
    %91 = vector.extract_strided_slice %15 {offsets = [30, 0], sizes = [2, 144], strides = [1, 1]} : vector<64x144xf32> to vector<2x144xf32>
    %92 = arith.truncf %91 : vector<2x144xf32> to vector<2x144xbf16>
    %c15 = arith.constant 15 : index
    %c0_52 = arith.constant 0 : index
    %c0_53 = arith.constant 0 : index
    %93 = vector.load %arg3[%c15, %c0_52, %c0_53] : memref<32x144x128xbf16, #tpu.memory_space<vmem>>, vector<1x144x128xbf16>
    %94 = vector.shape_cast %93 : vector<1x144x128xbf16> to vector<144x128xbf16>
    %cst_54 = arith.constant dense<0.000000e+00> : vector<2x128xf32>
    %95 = tpu.matmul %92, %94, %cst_54 {dimension_numbers = #tpu.dot_dimension_numbers<[1], [0], [0], [1], [0, 0, 1, 1], [], []>} : vector<2x144xbf16>, vector<144x128xbf16>, vector<2x128xf32> -> vector<2x128xf32>
    %96 = vector.extract_strided_slice %15 {offsets = [32, 0], sizes = [2, 144], strides = [1, 1]} : vector<64x144xf32> to vector<2x144xf32>
    %97 = arith.truncf %96 : vector<2x144xf32> to vector<2x144xbf16>
    %c16 = arith.constant 16 : index
    %c0_55 = arith.constant 0 : index
    %c0_56 = arith.constant 0 : index
    %98 = vector.load %arg3[%c16, %c0_55, %c0_56] : memref<32x144x128xbf16, #tpu.memory_space<vmem>>, vector<1x144x128xbf16>
    %99 = vector.shape_cast %98 : vector<1x144x128xbf16> to vector<144x128xbf16>
    %cst_57 = arith.constant dense<0.000000e+00> : vector<2x128xf32>
    %100 = tpu.matmul %97, %99, %cst_57 {dimension_numbers = #tpu.dot_dimension_numbers<[1], [0], [0], [1], [0, 0, 1, 1], [], []>} : vector<2x144xbf16>, vector<144x128xbf16>, vector<2x128xf32> -> vector<2x128xf32>
    %101 = vector.extract_strided_slice %15 {offsets = [34, 0], sizes = [2, 144], strides = [1, 1]} : vector<64x144xf32> to vector<2x144xf32>
    %102 = arith.truncf %101 : vector<2x144xf32> to vector<2x144xbf16>
    %c17 = arith.constant 17 : index
    %c0_58 = arith.constant 0 : index
    %c0_59 = arith.constant 0 : index
    %103 = vector.load %arg3[%c17, %c0_58, %c0_59] : memref<32x144x128xbf16, #tpu.memory_space<vmem>>, vector<1x144x128xbf16>
    %104 = vector.shape_cast %103 : vector<1x144x128xbf16> to vector<144x128xbf16>
    %cst_60 = arith.constant dense<0.000000e+00> : vector<2x128xf32>
    %105 = tpu.matmul %102, %104, %cst_60 {dimension_numbers = #tpu.dot_dimension_numbers<[1], [0], [0], [1], [0, 0, 1, 1], [], []>} : vector<2x144xbf16>, vector<144x128xbf16>, vector<2x128xf32> -> vector<2x128xf32>
    %106 = vector.extract_strided_slice %15 {offsets = [36, 0], sizes = [2, 144], strides = [1, 1]} : vector<64x144xf32> to vector<2x144xf32>
    %107 = arith.truncf %106 : vector<2x144xf32> to vector<2x144xbf16>
    %c18 = arith.constant 18 : index
    %c0_61 = arith.constant 0 : index
    %c0_62 = arith.constant 0 : index
    %108 = vector.load %arg3[%c18, %c0_61, %c0_62] : memref<32x144x128xbf16, #tpu.memory_space<vmem>>, vector<1x144x128xbf16>
    %109 = vector.shape_cast %108 : vector<1x144x128xbf16> to vector<144x128xbf16>
    %cst_63 = arith.constant dense<0.000000e+00> : vector<2x128xf32>
    %110 = tpu.matmul %107, %109, %cst_63 {dimension_numbers = #tpu.dot_dimension_numbers<[1], [0], [0], [1], [0, 0, 1, 1], [], []>} : vector<2x144xbf16>, vector<144x128xbf16>, vector<2x128xf32> -> vector<2x128xf32>
    %111 = vector.extract_strided_slice %15 {offsets = [38, 0], sizes = [2, 144], strides = [1, 1]} : vector<64x144xf32> to vector<2x144xf32>
    %112 = arith.truncf %111 : vector<2x144xf32> to vector<2x144xbf16>
    %c19 = arith.constant 19 : index
    %c0_64 = arith.constant 0 : index
    %c0_65 = arith.constant 0 : index
    %113 = vector.load %arg3[%c19, %c0_64, %c0_65] : memref<32x144x128xbf16, #tpu.memory_space<vmem>>, vector<1x144x128xbf16>
    %114 = vector.shape_cast %113 : vector<1x144x128xbf16> to vector<144x128xbf16>
    %cst_66 = arith.constant dense<0.000000e+00> : vector<2x128xf32>
    %115 = tpu.matmul %112, %114, %cst_66 {dimension_numbers = #tpu.dot_dimension_numbers<[1], [0], [0], [1], [0, 0, 1, 1], [], []>} : vector<2x144xbf16>, vector<144x128xbf16>, vector<2x128xf32> -> vector<2x128xf32>
    %116 = vector.extract_strided_slice %15 {offsets = [40, 0], sizes = [2, 144], strides = [1, 1]} : vector<64x144xf32> to vector<2x144xf32>
    %117 = arith.truncf %116 : vector<2x144xf32> to vector<2x144xbf16>
    %c20 = arith.constant 20 : index
    %c0_67 = arith.constant 0 : index
    %c0_68 = arith.constant 0 : index
    %118 = vector.load %arg3[%c20, %c0_67, %c0_68] : memref<32x144x128xbf16, #tpu.memory_space<vmem>>, vector<1x144x128xbf16>
    %119 = vector.shape_cast %118 : vector<1x144x128xbf16> to vector<144x128xbf16>
    %cst_69 = arith.constant dense<0.000000e+00> : vector<2x128xf32>
    %120 = tpu.matmul %117, %119, %cst_69 {dimension_numbers = #tpu.dot_dimension_numbers<[1], [0], [0], [1], [0, 0, 1, 1], [], []>} : vector<2x144xbf16>, vector<144x128xbf16>, vector<2x128xf32> -> vector<2x128xf32>
    %121 = vector.extract_strided_slice %15 {offsets = [42, 0], sizes = [2, 144], strides = [1, 1]} : vector<64x144xf32> to vector<2x144xf32>
    %122 = arith.truncf %121 : vector<2x144xf32> to vector<2x144xbf16>
    %c21 = arith.constant 21 : index
    %c0_70 = arith.constant 0 : index
    %c0_71 = arith.constant 0 : index
    %123 = vector.load %arg3[%c21, %c0_70, %c0_71] : memref<32x144x128xbf16, #tpu.memory_space<vmem>>, vector<1x144x128xbf16>
    %124 = vector.shape_cast %123 : vector<1x144x128xbf16> to vector<144x128xbf16>
    %cst_72 = arith.constant dense<0.000000e+00> : vector<2x128xf32>
    %125 = tpu.matmul %122, %124, %cst_72 {dimension_numbers = #tpu.dot_dimension_numbers<[1], [0], [0], [1], [0, 0, 1, 1], [], []>} : vector<2x144xbf16>, vector<144x128xbf16>, vector<2x128xf32> -> vector<2x128xf32>
    %126 = vector.extract_strided_slice %15 {offsets = [44, 0], sizes = [2, 144], strides = [1, 1]} : vector<64x144xf32> to vector<2x144xf32>
    %127 = arith.truncf %126 : vector<2x144xf32> to vector<2x144xbf16>
    %c22 = arith.constant 22 : index
    %c0_73 = arith.constant 0 : index
    %c0_74 = arith.constant 0 : index
    %128 = vector.load %arg3[%c22, %c0_73, %c0_74] : memref<32x144x128xbf16, #tpu.memory_space<vmem>>, vector<1x144x128xbf16>
    %129 = vector.shape_cast %128 : vector<1x144x128xbf16> to vector<144x128xbf16>
    %cst_75 = arith.constant dense<0.000000e+00> : vector<2x128xf32>
    %130 = tpu.matmul %127, %129, %cst_75 {dimension_numbers = #tpu.dot_dimension_numbers<[1], [0], [0], [1], [0, 0, 1, 1], [], []>} : vector<2x144xbf16>, vector<144x128xbf16>, vector<2x128xf32> -> vector<2x128xf32>
    %131 = vector.extract_strided_slice %15 {offsets = [46, 0], sizes = [2, 144], strides = [1, 1]} : vector<64x144xf32> to vector<2x144xf32>
    %132 = arith.truncf %131 : vector<2x144xf32> to vector<2x144xbf16>
    %c23 = arith.constant 23 : index
    %c0_76 = arith.constant 0 : index
    %c0_77 = arith.constant 0 : index
    %133 = vector.load %arg3[%c23, %c0_76, %c0_77] : memref<32x144x128xbf16, #tpu.memory_space<vmem>>, vector<1x144x128xbf16>
    %134 = vector.shape_cast %133 : vector<1x144x128xbf16> to vector<144x128xbf16>
    %cst_78 = arith.constant dense<0.000000e+00> : vector<2x128xf32>
    %135 = tpu.matmul %132, %134, %cst_78 {dimension_numbers = #tpu.dot_dimension_numbers<[1], [0], [0], [1], [0, 0, 1, 1], [], []>} : vector<2x144xbf16>, vector<144x128xbf16>, vector<2x128xf32> -> vector<2x128xf32>
    %136 = vector.extract_strided_slice %15 {offsets = [48, 0], sizes = [2, 144], strides = [1, 1]} : vector<64x144xf32> to vector<2x144xf32>
    %137 = arith.truncf %136 : vector<2x144xf32> to vector<2x144xbf16>
    %c24 = arith.constant 24 : index
    %c0_79 = arith.constant 0 : index
    %c0_80 = arith.constant 0 : index
    %138 = vector.load %arg3[%c24, %c0_79, %c0_80] : memref<32x144x128xbf16, #tpu.memory_space<vmem>>, vector<1x144x128xbf16>
    %139 = vector.shape_cast %138 : vector<1x144x128xbf16> to vector<144x128xbf16>
    %cst_81 = arith.constant dense<0.000000e+00> : vector<2x128xf32>
    %140 = tpu.matmul %137, %139, %cst_81 {dimension_numbers = #tpu.dot_dimension_numbers<[1], [0], [0], [1], [0, 0, 1, 1], [], []>} : vector<2x144xbf16>, vector<144x128xbf16>, vector<2x128xf32> -> vector<2x128xf32>
    %141 = vector.extract_strided_slice %15 {offsets = [50, 0], sizes = [2, 144], strides = [1, 1]} : vector<64x144xf32> to vector<2x144xf32>
    %142 = arith.truncf %141 : vector<2x144xf32> to vector<2x144xbf16>
    %c25 = arith.constant 25 : index
    %c0_82 = arith.constant 0 : index
    %c0_83 = arith.constant 0 : index
    %143 = vector.load %arg3[%c25, %c0_82, %c0_83] : memref<32x144x128xbf16, #tpu.memory_space<vmem>>, vector<1x144x128xbf16>
    %144 = vector.shape_cast %143 : vector<1x144x128xbf16> to vector<144x128xbf16>
    %cst_84 = arith.constant dense<0.000000e+00> : vector<2x128xf32>
    %145 = tpu.matmul %142, %144, %cst_84 {dimension_numbers = #tpu.dot_dimension_numbers<[1], [0], [0], [1], [0, 0, 1, 1], [], []>} : vector<2x144xbf16>, vector<144x128xbf16>, vector<2x128xf32> -> vector<2x128xf32>
    %146 = vector.extract_strided_slice %15 {offsets = [52, 0], sizes = [2, 144], strides = [1, 1]} : vector<64x144xf32> to vector<2x144xf32>
    %147 = arith.truncf %146 : vector<2x144xf32> to vector<2x144xbf16>
    %c26 = arith.constant 26 : index
    %c0_85 = arith.constant 0 : index
    %c0_86 = arith.constant 0 : index
    %148 = vector.load %arg3[%c26, %c0_85, %c0_86] : memref<32x144x128xbf16, #tpu.memory_space<vmem>>, vector<1x144x128xbf16>
    %149 = vector.shape_cast %148 : vector<1x144x128xbf16> to vector<144x128xbf16>
    %cst_87 = arith.constant dense<0.000000e+00> : vector<2x128xf32>
    %150 = tpu.matmul %147, %149, %cst_87 {dimension_numbers = #tpu.dot_dimension_numbers<[1], [0], [0], [1], [0, 0, 1, 1], [], []>} : vector<2x144xbf16>, vector<144x128xbf16>, vector<2x128xf32> -> vector<2x128xf32>
    %151 = vector.extract_strided_slice %15 {offsets = [54, 0], sizes = [2, 144], strides = [1, 1]} : vector<64x144xf32> to vector<2x144xf32>
    %152 = arith.truncf %151 : vector<2x144xf32> to vector<2x144xbf16>
    %c27 = arith.constant 27 : index
    %c0_88 = arith.constant 0 : index
    %c0_89 = arith.constant 0 : index
    %153 = vector.load %arg3[%c27, %c0_88, %c0_89] : memref<32x144x128xbf16, #tpu.memory_space<vmem>>, vector<1x144x128xbf16>
    %154 = vector.shape_cast %153 : vector<1x144x128xbf16> to vector<144x128xbf16>
    %cst_90 = arith.constant dense<0.000000e+00> : vector<2x128xf32>
    %155 = tpu.matmul %152, %154, %cst_90 {dimension_numbers = #tpu.dot_dimension_numbers<[1], [0], [0], [1], [0, 0, 1, 1], [], []>} : vector<2x144xbf16>, vector<144x128xbf16>, vector<2x128xf32> -> vector<2x128xf32>
    %156 = vector.extract_strided_slice %15 {offsets = [56, 0], sizes = [2, 144], strides = [1, 1]} : vector<64x144xf32> to vector<2x144xf32>
    %157 = arith.truncf %156 : vector<2x144xf32> to vector<2x144xbf16>
    %c28 = arith.constant 28 : index
    %c0_91 = arith.constant 0 : index
    %c0_92 = arith.constant 0 : index
    %158 = vector.load %arg3[%c28, %c0_91, %c0_92] : memref<32x144x128xbf16, #tpu.memory_space<vmem>>, vector<1x144x128xbf16>
    %159 = vector.shape_cast %158 : vector<1x144x128xbf16> to vector<144x128xbf16>
    %cst_93 = arith.constant dense<0.000000e+00> : vector<2x128xf32>
    %160 = tpu.matmul %157, %159, %cst_93 {dimension_numbers = #tpu.dot_dimension_numbers<[1], [0], [0], [1], [0, 0, 1, 1], [], []>} : vector<2x144xbf16>, vector<144x128xbf16>, vector<2x128xf32> -> vector<2x128xf32>
    %161 = vector.extract_strided_slice %15 {offsets = [58, 0], sizes = [2, 144], strides = [1, 1]} : vector<64x144xf32> to vector<2x144xf32>
    %162 = arith.truncf %161 : vector<2x144xf32> to vector<2x144xbf16>
    %c29 = arith.constant 29 : index
    %c0_94 = arith.constant 0 : index
    %c0_95 = arith.constant 0 : index
    %163 = vector.load %arg3[%c29, %c0_94, %c0_95] : memref<32x144x128xbf16, #tpu.memory_space<vmem>>, vector<1x144x128xbf16>
    %164 = vector.shape_cast %163 : vector<1x144x128xbf16> to vector<144x128xbf16>
    %cst_96 = arith.constant dense<0.000000e+00> : vector<2x128xf32>
    %165 = tpu.matmul %162, %164, %cst_96 {dimension_numbers = #tpu.dot_dimension_numbers<[1], [0], [0], [1], [0, 0, 1, 1], [], []>} : vector<2x144xbf16>, vector<144x128xbf16>, vector<2x128xf32> -> vector<2x128xf32>
    %166 = vector.extract_strided_slice %15 {offsets = [60, 0], sizes = [2, 144], strides = [1, 1]} : vector<64x144xf32> to vector<2x144xf32>
    %167 = arith.truncf %166 : vector<2x144xf32> to vector<2x144xbf16>
    %c30 = arith.constant 30 : index
    %c0_97 = arith.constant 0 : index
    %c0_98 = arith.constant 0 : index
    %168 = vector.load %arg3[%c30, %c0_97, %c0_98] : memref<32x144x128xbf16, #tpu.memory_space<vmem>>, vector<1x144x128xbf16>
    %169 = vector.shape_cast %168 : vector<1x144x128xbf16> to vector<144x128xbf16>
    %cst_99 = arith.constant dense<0.000000e+00> : vector<2x128xf32>
    %170 = tpu.matmul %167, %169, %cst_99 {dimension_numbers = #tpu.dot_dimension_numbers<[1], [0], [0], [1], [0, 0, 1, 1], [], []>} : vector<2x144xbf16>, vector<144x128xbf16>, vector<2x128xf32> -> vector<2x128xf32>
    %171 = vector.extract_strided_slice %15 {offsets = [62, 0], sizes = [2, 144], strides = [1, 1]} : vector<64x144xf32> to vector<2x144xf32>
    %172 = arith.truncf %171 : vector<2x144xf32> to vector<2x144xbf16>
    %c31 = arith.constant 31 : index
    %c0_100 = arith.constant 0 : index
    %c0_101 = arith.constant 0 : index
    %173 = vector.load %arg3[%c31, %c0_100, %c0_101] : memref<32x144x128xbf16, #tpu.memory_space<vmem>>, vector<1x144x128xbf16>
    %174 = vector.shape_cast %173 : vector<1x144x128xbf16> to vector<144x128xbf16>
    %cst_102 = arith.constant dense<0.000000e+00> : vector<2x128xf32>
    %175 = tpu.matmul %172, %174, %cst_102 {dimension_numbers = #tpu.dot_dimension_numbers<[1], [0], [0], [1], [0, 0, 1, 1], [], []>} : vector<2x144xbf16>, vector<144x128xbf16>, vector<2x128xf32> -> vector<2x128xf32>
    %176 = arith.addf %20, %25 : vector<2x128xf32>
    %177 = arith.addf %30, %35 : vector<2x128xf32>
    %178 = arith.addf %40, %45 : vector<2x128xf32>
    %179 = arith.addf %50, %55 : vector<2x128xf32>
    %180 = arith.addf %60, %65 : vector<2x128xf32>
    %181 = arith.addf %70, %75 : vector<2x128xf32>
    %182 = arith.addf %80, %85 : vector<2x128xf32>
    %183 = arith.addf %90, %95 : vector<2x128xf32>
    %184 = arith.addf %100, %105 : vector<2x128xf32>
    %185 = arith.addf %110, %115 : vector<2x128xf32>
    %186 = arith.addf %120, %125 : vector<2x128xf32>
    %187 = arith.addf %130, %135 : vector<2x128xf32>
    %188 = arith.addf %140, %145 : vector<2x128xf32>
    %189 = arith.addf %150, %155 : vector<2x128xf32>
    %190 = arith.addf %160, %165 : vector<2x128xf32>
    %191 = arith.addf %170, %175 : vector<2x128xf32>
    %192 = arith.addf %176, %177 : vector<2x128xf32>
    %193 = arith.addf %178, %179 : vector<2x128xf32>
    %194 = arith.addf %180, %181 : vector<2x128xf32>
    %195 = arith.addf %182, %183 : vector<2x128xf32>
    %196 = arith.addf %184, %185 : vector<2x128xf32>
    %197 = arith.addf %186, %187 : vector<2x128xf32>
    %198 = arith.addf %188, %189 : vector<2x128xf32>
    %199 = arith.addf %190, %191 : vector<2x128xf32>
    %200 = arith.addf %192, %193 : vector<2x128xf32>
    %201 = arith.addf %194, %195 : vector<2x128xf32>
    %202 = arith.addf %196, %197 : vector<2x128xf32>
    %203 = arith.addf %198, %199 : vector<2x128xf32>
    %204 = arith.addf %200, %201 : vector<2x128xf32>
    %205 = arith.addf %202, %203 : vector<2x128xf32>
    %206 = arith.addf %204, %205 : vector<2x128xf32>
    %c0_103 = arith.constant 0 : index
    %c0_104 = arith.constant 0 : index
    %207 = vector.load %arg4[%c0_103, %c0_104] : memref<1x128xf32, #tpu.memory_space<vmem>>, vector<1x128xf32>
    %208 = vector.broadcast %207 : vector<1x128xf32> to vector<2x128xf32>
    %209 = arith.addf %206, %208 : vector<2x128xf32>
    %cst_105 = arith.constant 0.000000e+00 : f32
    %210 = vector.broadcast %cst_105 : f32 to vector<2x128xf32>
    %211 = arith.maximumf %209, %210 : vector<2x128xf32>
    %212 = arith.truncf %211 : vector<2x128xf32> to vector<2x128xbf16>
    %c0_106 = arith.constant 0 : index
    %c0_107 = arith.constant 0 : index
    %213 = vector.load %arg5[%c0_106, %c0_107] : memref<128x10xbf16, #tpu.memory_space<vmem>>, vector<128x10xbf16>
    %cst_108 = arith.constant dense<0.000000e+00> : vector<2x10xf32>
    %214 = tpu.matmul %212, %213, %cst_108 {dimension_numbers = #tpu.dot_dimension_numbers<[1], [0], [0], [1], [0, 0, 1, 1], [], []>} : vector<2x128xbf16>, vector<128x10xbf16>, vector<2x10xf32> -> vector<2x10xf32>
    %c0_109 = arith.constant 0 : index
    %c0_110 = arith.constant 0 : index
    %215 = vector.load %arg6[%c0_109, %c0_110] : memref<1x10xf32, #tpu.memory_space<vmem>>, vector<1x10xf32>
    %216 = vector.broadcast %215 : vector<1x10xf32> to vector<2x10xf32>
    %217 = arith.addf %214, %216 : vector<2x10xf32>
    %cst_111 = arith.constant dense<0xFF800000> : vector<2xf32>
    %218 = vector.multi_reduction <maximumf>, %217, %cst_111 [1] : vector<2x10xf32> to vector<2xf32>
    %219 = vector.shape_cast %218 : vector<2xf32> to vector<2x1xf32>
    %220 = vector.broadcast %219 : vector<2x1xf32> to vector<2x10xf32>
    %221 = arith.subf %217, %220 : vector<2x10xf32>
    %222 = math.exp %221 : vector<2x10xf32>
    %cst_112 = arith.constant dense<0.000000e+00> : vector<2xf32>
    %223 = vector.multi_reduction <add>, %222, %cst_112 [1] : vector<2x10xf32> to vector<2xf32>
    %224 = vector.shape_cast %223 : vector<2xf32> to vector<2x1xf32>
    %225 = math.log %224 : vector<2x1xf32>
    %226 = arith.addf %219, %225 : vector<2x1xf32>
    %227 = vector.broadcast %226 : vector<2x1xf32> to vector<2x10xf32>
    %228 = arith.subf %217, %227 : vector<2x10xf32>
    %c0_113 = arith.constant 0 : index
    %c0_114 = arith.constant 0 : index
    %229 = vector.load %arg7[%c0_113, %c0_114] : memref<2x10xf32, #tpu.memory_space<vmem>>, vector<2x10xf32>
    tpu.vector_store %arg7[%c0_113, %c0_114], %228 {strides = array<i32>} : memref<2x10xf32, #tpu.memory_space<vmem>>, vector<2x10xf32>,
    return
  }
}

</mosaic_0001>

<bundles_post_ra>
// kernel: basic_cnn_forward.1
= control target key start
LH: loop header
LB: loop body
LE: loop exit
PB: predicated region body
PF: predicated region fallthrough
CT: control target
= control target key end

     0   :  { %s7971_s0 = inlined_call_operand.vmem [shape: bf16[64,1024], index: 0, kind: input, shape index: {}]   ;;  %s7972_s1 = inlined_call_operand.vmem [shape: bf16[64,64], index: 1, kind: input, shape index: {}]   ;;  %s7973_s2 = inlined_call_operand.vmem [shape: f32[64,1], index: 2, kind: input, shape index: {}]   ;;  %s7974_s3 = inlined_call_operand.vmem [shape: bf16[32,144,128], index: 3, kind: input, shape index: {}]   ;;  %s7975_s4 = inlined_call_operand.vmem [shape: f32[1,128], index: 4, kind: input, shape index: {}]   ;;  %s7976_s5 = inlined_call_operand.vmem [shape: bf16[128,10], index: 5, kind: input, shape index: {}]   ;;  %s7977_s6 = inlined_call_operand.vmem [shape: f32[1,10], index: 6, kind: input, shape index: {}]   ;;  %s7978_s7 = inlined_call_operand.hbm [shape: f32[2,10], index: 7, kind: output, shape index: {}]  }
   0x1   :  { %v6101_v0 = vld [vmem:[%s7971_s0 + $0xc4] sm:$0xf]  ;;  %v4245_v2 = vld [vmem:[%s7971_s0 + $0xc8] sm:$0xf]  ;;  %v4237_v10 = vld [vmem:[%s7971_s0 + $0xc0] sm:$0xf] }
   0x2   :  { %v4239_v1 = vld [vmem:[%s7971_s0 + $0xe0] sm:$0xf0]  ;;  %v6106_v4 = vld [vmem:[%s7971_s0 + $0xe4] sm:$0xf0]  ;;  %v6105_v12 = vld [vmem:[%s7971_s0 + $0xdc] sm:$0xf0] }
   0x3   :  { %v4242_v3 = vor.u32 %v6101_v0, %v4239_v1  ;;  %v6093_v5 = vld [vmem:[%s7971_s0 + $0x84] sm:$0xf]  ;;  %v4246_v7 = vor.u32 %v6106_v4, %v4245_v2  ;;  %v4213_v8 = vld [vmem:[%s7971_s0 + $0x88] sm:$0xf]  ;;  %v4238_v14 = vor.u32 %v6105_v12, %v4237_v10  ;;  %v4205_v17 = vld [vmem:[%s7971_s0 + $0x80] sm:$0xf] }
   0x4   :  { %v4207_v6 = vld [vmem:[%s7971_s0 + $0xa0] sm:$0xf0]  ;;  %v6098_v9 = vld [vmem:[%s7971_s0 + $0xa4] sm:$0xf0]  ;;  %v6097_v20 = vld [vmem:[%s7971_s0 + $0x9c] sm:$0xf0] }
   0x5   :  { %6405 = vmatpush.bf16.msra.mxu3 %v4242_v3  ;;  %v4210_v11 = vor.u32 %v6093_v5, %v4207_v6  ;;  %294 = vmatpush.bf16.msra.mxu1 %v4242_v3  ;;  %v4214_v13 = vor.u32 %v6098_v9, %v4213_v8  ;;  %v6085_v15 = vld [vmem:[%s7971_s0 + $0x44] sm:$0xf]  ;;  %v4181_v18 = vld [vmem:[%s7971_s0 + $0x48] sm:$0xf]  ;;  %v4206_v21 = vor.u32 %v6097_v20, %v4205_v17  ;;  %v4173_v23 = vld [vmem:[%s7971_s0 + $0x40] sm:$0xf] }
   0x6   :  { %323 = vmatpush.bf16.msra.mxu2 %v4246_v7  ;;  %v4175_v16 = vld [vmem:[%s7971_s0 + $0x60] sm:$0xf0]  ;;  %v6090_v19 = vld [vmem:[%s7971_s0 + $0x64] sm:$0xf0]  ;;  %265 = vmatpush.bf16.msra.mxu0 %v4238_v14  ;;  %v6089_v24 = vld [vmem:[%s7971_s0 + $0x5c] sm:$0xf0] }
   0x7   :  { %v4178_v22 = vor.u32 %v6085_v15, %v4175_v16  ;;  %v4182_v25 = vor.u32 %v6090_v19, %v4181_v18  ;;  %v6077_v26 = vld [vmem:[%s7971_s0 + $0x4] sm:$0xf]  ;;  %v4149_v28 = vld [vmem:[%s7971_s0 + $0x8] sm:$0xf]  ;;  %v6102_v30 = vld [vmem:[%s7971_s0 + $0xcc] sm:$0xf]  ;;  %v4174_v32 = vor.u32 %v6089_v24, %v4173_v23 }
   0x8   :  { %v4143_v27 = vld [vmem:[%s7971_s0 + $0x20] sm:$0xf0]  ;;  %v6082_v29 = vld [vmem:[%s7971_s0 + $0x24] sm:$0xf0]  ;;  %v4247_v31 = vld [vmem:[%s7971_s0 + $0xe8] sm:$0xf0] }
   0x9   :  { %6406 = vmatpush.bf16.msra.mxu3 %v4210_v11  ;;  %295 = vmatpush.bf16.msra.mxu1 %v4210_v11  ;;  %v4146_v33 = vor.u32 %v6077_v26, %v4143_v27  ;;  %v4141_v34 = vld [vmem:[%s7971_s0] sm:$0xf]  ;;  %v4261_v36 = vld [vmem:[%s7971_s0 + $0xd8] sm:$0xf]  ;;  %v4150_v37 = vor.u32 %v6082_v29, %v4149_v28  ;;  %v4250_v39 = vor.u32 %v6102_v30, %v4247_v31  ;;  %v6094_v40 = vld [vmem:[%s7971_s0 + $0x8c] sm:$0xf] }
   0xa   :  { %324 = vmatpush.bf16.msra.mxu2 %v4214_v13  ;;  %266 = vmatpush.bf16.msra.mxu0 %v4206_v21  ;;  %v6081_v35 = vld [vmem:[%s7971_s0 + $0x1c] sm:$0xf0]  ;;  %v6572_v38 = vld [vmem:[%s7972_s1 + $0x18] sm:$0xff]  ;;  %v4215_v42 = vld [vmem:[%s7971_s0 + $0xa8] sm:$0xf0] }
   0xb   :  { %v6108_v41 = vld [vmem:[%s7971_s0 + $0xf4] sm:$0xf0]  ;;  %v4253_v44 = vld [vmem:[%s7971_s0 + $0xd0] sm:$0xf]  ;;  %v4142_v46 = vor.u32 %v6081_v35, %v4141_v34 }
   0xc   :  { %v4262_v43 = vor.u32 %v6108_v41, %v4261_v36  ;;  %v6107_v45 = vld [vmem:[%s7971_s0 + $0xec] sm:$0xf0] }
   0xd   :  { %6407 = vmatpush.bf16.msra.mxu3 %v4178_v22  ;;  %296 = vmatpush.bf16.msra.mxu1 %v4178_v22 }
   0xe   :  { %325 = vmatpush.bf16.msra.mxu2 %v4182_v25  ;;  %267 = vmatpush.bf16.msra.mxu0 %v4174_v32 }
   0xf   :  { %12 = vsyncpa [#allocation3], 0  ;;  %vm248_vm0 = vcmask 523264   ;;  %v6592_v47 = vld [vmem:[%s7972_s1] sm:$0xff]  ;;  %v4218_v48 = vor.u32 %v6094_v40, %v4215_v42  ;;  %v4254_v49 = vor.u32 %v6107_v45, %v4253_v44  ;;  %v6086_v50 = vld [vmem:[%s7971_s0 + $0x4c] sm:$0xf] }
  0x10   :  { %v4183_v51 = vld [vmem:[%s7971_s0 + $0x68] sm:$0xf0]  ;;  %v4229_v52 = vld [vmem:[%s7971_s0 + $0x98] sm:$0xf]  ;;  %v4221_v58 = vld [vmem:[%s7971_s0 + $0x90] sm:$0xf] }
  0x11   :  { %6408 = vmatpush.bf16.msra.mxu3 %v4146_v33  ;;  %297 = vmatpush.bf16.msra.mxu1 %v4146_v33  ;;  %v6100_v53 = vld [vmem:[%s7971_s0 + $0xb4] sm:$0xf0]  ;;  %v4186_v54 = vor.u32 %v6086_v50, %v4183_v51  ;;  %v6078_v55 = vld [vmem:[%s7971_s0 + $0xc] sm:$0xf]  ;;  %v6099_v59 = vld [vmem:[%s7971_s0 + $0xac] sm:$0xf0] }
  0x12   :  { %326 = vmatpush.bf16.msra.mxu2 %v4150_v37  ;;  %268 = vmatpush.bf16.msra.mxu0 %v4142_v46  ;;  %v4151_v56 = vld [vmem:[%s7971_s0 + $0x28] sm:$0xf0]  ;;  %v4230_v57 = vor.u32 %v6100_v53, %v4229_v52  ;;  %v6103_v60 = vld [vmem:[%s7971_s0 + $0xd4] sm:$0xf]  ;;  %v6104_v61 = vld [vmem:[%s7971_s0 + $0xdc] sm:$0xf]  ;;  %v4222_v63 = vor.u32 %v6099_v59, %v4221_v58 }
  0x13   :  { %v4263_v62 = vld [vmem:[%s7971_s0 + $0xf8] sm:$0xf0]  ;;  %v4255_v0 = vld [vmem:[%s7971_s0 + $0xf0] sm:$0xf0]  ;;  %v4154_v2 = vor.u32 %v6078_v55, %v4151_v56  ;;  %v6647_v7 = vld [vmem:[%s7972_s1 + $0x8] sm:$0xff]  ;;  %v6446_v37 = vmov 0  }
  0x14   :  { %4274 = vmatmul.msk.bf16.vlgmr.msra.gmra.mxu3 %vm248_vm0, %v6572_v38  ;;  %4271 = vmatmul.msk.bf16.vlgmr.msra.gmra.mxu1 %vm248_vm0, %v6592_v47  ;;  %v4258_v1 = vor.u32 %v6103_v60, %v4255_v0  ;;  %v4266_v3 = vor.u32 %v6104_v61, %v4263_v62  ;;  %v6096_v4 = vld [vmem:[%s7971_s0 + $0x9c] sm:$0xf]  ;;  %v4197_v8 = vld [vmem:[%s7971_s0 + $0x58] sm:$0xf]  ;;  %v6095_v13 = vld [vmem:[%s7971_s0 + $0x94] sm:$0xf] }
  0x15   :  { %352 = vmatpush.bf16.msrb.mxu3 %v4250_v39  ;;  %4275 = vmatmul.msk.bf16.vlgmr.msra.gmra.mxu2 %vm248_vm0, %v6592_v47  ;;  %v4231_v5 = vld [vmem:[%s7971_s0 + $0xb8] sm:$0xf0]  ;;  %v6092_v9 = vld [vmem:[%s7971_s0 + $0x74] sm:$0xf0]  ;;  %v4223_v14 = vld [vmem:[%s7971_s0 + $0xb0] sm:$0xf0] }
  0x16   :  { %439 = vmatpush.bf16.msrb.mxu2 %v4262_v43  ;;  %381 = vmatpush.bf16.msrb.mxu0 %v4254_v49  ;;  %v4234_v6 = vor.u32 %v6096_v4, %v4231_v5  ;;  %v6088_v10 = vld [vmem:[%s7971_s0 + $0x5c] sm:$0xf]  ;;  %v4198_v11 = vor.u32 %v6092_v9, %v4197_v8  ;;  %v4226_v16 = vor.u32 %v6095_v13, %v4223_v14  ;;  %v4189_v17 = vld [vmem:[%s7971_s0 + $0x50] sm:$0xf]  ;;  %v4165_v19 = vld [vmem:[%s7971_s0 + $0x18] sm:$0xf] }
  0x17   :  { %4267 = vmatmul.msk.bf16.vlgmr.msra.gmra.mxu0 %vm248_vm0, %v6592_v47  ;;  %410 = vmatpush.bf16.msrb.mxu1 %v4258_v1  ;;  %v4199_v12 = vld [vmem:[%s7971_s0 + $0x78] sm:$0xf0]  ;;  %v6091_v18 = vld [vmem:[%s7971_s0 + $0x6c] sm:$0xf0]  ;;  %v6084_v21 = vld [vmem:[%s7971_s0 + $0x34] sm:$0xf0] }
  0x18   :  { %v4202_v15 = vor.u32 %v6088_v10, %v4199_v12  ;;  %v4190_v20 = vor.u32 %v6091_v18, %v4189_v17  ;;  %v6087_v22 = vld [vmem:[%s7971_s0 + $0x54] sm:$0xf]  ;;  %v4166_v24 = vor.u32 %v6084_v21, %v4165_v19  ;;  %v6080_v27 = vld [vmem:[%s7971_s0 + $0x1c] sm:$0xf]  ;;  %v4157_v29 = vld [vmem:[%s7971_s0 + $0x10] sm:$0xf]  ;;  %6411 = vset.pattern.permute.xlu0 %v6446_v37  ;;  %6412 = vset.pattern.permute.xlu1 %v6446_v37 }
  0x19   :  { %353 = vmatpush.bf16.msrb.mxu3 %v4218_v48  ;;  %v4191_v23 = vld [vmem:[%s7971_s0 + $0x70] sm:$0xf0]  ;;  %v4167_v28 = vld [vmem:[%s7971_s0 + $0x38] sm:$0xf0]  ;;  %v6083_v31 = vld [vmem:[%s7971_s0 + $0x2c] sm:$0xf0]  ;;  %6413 = vset.pattern.permute.xlu2 %v6446_v37 }
  0x1a   :  { %440 = vmatpush.bf16.msrb.mxu2 %v4230_v57  ;;  %382 = vmatpush.bf16.msrb.mxu0 %v4222_v63  ;;  %v4194_v25 = vor.u32 %v6087_v22, %v4191_v23  ;;  %v6075_v26 = vld [vmem:[%s7972_s1 + $0x10] sm:$0xff]  ;;  %v4170_v30 = vor.u32 %v6080_v27, %v4167_v28  ;;  %v4158_v32 = vor.u32 %v6083_v31, %v4157_v29  ;;  %v541_v36 = vld [vmem:[%s7973_s2] sm:$0xff]  ;;  %v542_v39 = vld [vmem:[%s7973_s2 + $0x8] sm:$0xff]  ;;  %vm719_vm1 = vcmask 130048   ;;  %s4114_s11 = sshll.u32 %s7978_s7, 4  ;;  %s4115_s11 = int_to_ptr.hbm [resolvable:$true] %s4114_s11 }
  0x1b   :  { %411 = vmatpush.bf16.msrb.mxu1 %v4226_v16  ;;  %v6079_v33 = vld [vmem:[%s7971_s0 + $0x14] sm:$0xf]  ;;  %551 = vperm.xlu0 %6411, %v541_v36   ;;  %v544_v42 = vld [vmem:[%s7973_s2 + $0x18] sm:$0xff]  ;;  %v545_v44 = vld [vmem:[%s7973_s2 + $0x20] sm:$0xff]  ;;  %vm4092_vm2 = vcmask 74752  }
  0x1c   :  { %v4159_v34 = vld [vmem:[%s7971_s0 + $0x30] sm:$0xf0]  ;;  %v548_v43 = vld [vmem:[%s7973_s2 + $0x38] sm:$0xff]  ;;  %571 = vperm.xlu2 %6413, %v545_v44   ;;  %v546_v45 = vld [vmem:[%s7973_s2 + $0x28] sm:$0xff] }
  0x1d   :  { %354 = vmatpush.bf16.msrb.mxu3 %v4186_v54  ;;  %v4162_v35 = vor.u32 %v6079_v33, %v4159_v34  ;;  %v543_v40 = vld [vmem:[%s7973_s2 + $0x10] sm:$0xff]  ;;  %v6125_v46 = vld [vmem:[%s7974_s3 + $0x80] sm:$0xff]  ;;  %v6144_v50 = vld [vmem:[%s7974_s3 + $0x118] sm:$0xff] }
  0x1e   :  { %441 = vmatpush.bf16.msrb.mxu2 %v4198_v11  ;;  %383 = vmatpush.bf16.msrb.mxu0 %v4190_v20  ;;  %v547_v41 = vld [vmem:[%s7973_s2 + $0x30] sm:$0xff]  ;;  %v6122_v52 = vld [vmem:[%s7974_s3 + $0x68] sm:$0xff]  ;;  %v6121_v56 = vld [vmem:[%s7974_s3 + $0x60] sm:$0xff] }
  0x1f   :  { %412 = vmatpush.bf16.msrb.mxu1 %v4194_v25  ;;  %561 = vperm.xlu1 %6412, %v543_v40   ;;  %v6123_v48 = vld [vmem:[%s7974_s3 + $0x70] sm:$0xff]  ;;  %v6142_v57 = vld [vmem:[%s7974_s3 + $0x108] sm:$0xff]  ;;  %v6120_v60 = vld [vmem:[%s7974_s3 + $0x58] sm:$0xff] }
  0x20   :  { %v6143_v49 = vld [vmem:[%s7974_s3 + $0x110] sm:$0xff]  ;;  %v6141_v62 = vld [vmem:[%s7974_s3 + $0x100] sm:$0xff]  ;;  %v6140_v1 = vld [vmem:[%s7974_s3 + $0xf8] sm:$0xff] }
  0x21   :  { %355 = vmatpush.bf16.msrb.mxu3 %v4154_v2  ;;  %v6119_v0 = vld [vmem:[%s7974_s3 + $0x50] sm:$0xff]  ;;  %v6138_v10 = vld [vmem:[%s7974_s3 + $0xe8] sm:$0xff]  ;;  %v6160_v11 = vld [vmem:[%s7974_s3 + $0x198] sm:$0xff] }
  0x22   :  { %442 = vmatpush.bf16.msrb.mxu2 %v4166_v24  ;;  %384 = vmatpush.bf16.msrb.mxu0 %v4158_v32  ;;  %v6137_v14 = vld [vmem:[%s7974_s3 + $0xe0] sm:$0xff]  ;;  %v6136_v18 = vld [vmem:[%s7974_s3 + $0xd8] sm:$0xff]  ;;  %v6158_v19 = vld [vmem:[%s7974_s3 + $0x188] sm:$0xff] }
  0x23   :  { %413 = vmatpush.bf16.msrb.mxu1 %v4162_v35  ;;  %556 = vperm.xlu0 %6411, %v542_v39   ;;  %v6179_v20 = vld [vmem:[%s7974_s3 + $0x230] sm:$0xff]  ;;  %v6157_v23 = vld [vmem:[%s7974_s3 + $0x180] sm:$0xff]  ;;  %v6178_v25 = vld [vmem:[%s7974_s3 + $0x228] sm:$0xff] }
  0x24   :  { %4279 = vmatmul.msk.bf16.vlgmr.msrb.gmra.mxu3 %vm248_vm0, %v6592_v47  ;;  %4272 = vmatmul.msk.bf16.gmra.mxu1 %vm248_vm0, %v6647_v7  ;;  %v6156_v28 = vld [vmem:[%s7974_s3 + $0x178] sm:$0xff]  ;;  %v6155_v32 = vld [vmem:[%s7974_s3 + $0x170] sm:$0xff]  ;;  %v6154_v35 = vld [vmem:[%s7974_s3 + $0x168] sm:$0xff] }
  0x25   :  { %468 = vmatpush.bf16.msra.mxu3 %v4266_v3  ;;  %4276 = vmatmul.msk.bf16.gmra.mxu2 %vm248_vm0, %v6647_v7  ;;  %v6118_v3 = vld [vmem:[%s7974_s3 + $0x48] sm:$0xff]  ;;  %v6176_v34 = vld [vmem:[%s7974_s3 + $0x218] sm:$0xff]  ;;  %v6175_v37 = vld [vmem:[%s7974_s3 + $0x210] sm:$0xff] }
  0x26   :  { %576 = vperm.xlu2 %6413, %v546_v45   ;;  %723 = vmatpush.bf16.msra.mxu0 %v6125_v46  ;;  %v6173_v46 = vld [vmem:[%s7974_s3 + $0x200] sm:$0xff] }
  0x27   :  { %4268 = vmatmul.msk.bf16.gmra.mxu0 %vm248_vm0, %v6647_v7  ;;  %566 = vperm.xlu1 %6412, %v544_v42  }
  0x28   :  { %847 = vmatpush.bf16.msra.mxu2 %v6143_v49  ;;  %v6172_v49 = vld [vmem:[%s7974_s3 + $0x1f8] sm:$0xff] }
  0x29   :  { %469 = vmatpush.bf16.msra.mxu3 %v4234_v6  ;;  %v6139_v6 = vld [vmem:[%s7974_s3 + $0xf0] sm:$0xff] }
  0x2b   :  { %581 = vperm.xlu0 %6411, %v547_v41  }
  0x2c   :  { %848 = vmatpush.bf16.msra.mxu2 %v6142_v57 }
  0x2d   :  { %470 = vmatpush.bf16.msra.mxu3 %v4202_v15  ;;  %v6159_v15 = vld [vmem:[%s7974_s3 + $0x190] sm:$0xff] }
  0x2f   :  { %586 = vperm.xlu1 %6412, %v548_v43   ;;  %v6174_v43 = vld [vmem:[%s7974_s3 + $0x208] sm:$0xff] }
  0x30   :  { %849 = vmatpush.bf16.msra.mxu2 %v6141_v62 }
  0x31   :  { %471 = vmatpush.bf16.msra.mxu3 %v4170_v30  ;;  %v6177_v30 = vld [vmem:[%s7974_s3 + $0x220] sm:$0xff] }
  0x34   :  { %4280 = vmatmul.msk.bf16.gmra.mxu3 %vm248_vm0, %v6647_v7  ;;  %4273 = vmatmul.msk.bf16.gmra.mxu1 %vm248_vm0, %v6075_v26 }
  0x35   :  { %4277 = vmatmul.msk.bf16.gmra.mxu2 %vm248_vm0, %v6075_v26  ;;  %867 = vmatpush.bf16.msrb.mxu3 %v6144_v50  ;;  %v6162_v50 = vld [vmem:[%s7974_s3 + $0x1a8] sm:$0xff] }
  0x36   :  { %850 = vmatpush.bf16.msra.mxu2 %v6140_v1 }
  0x37   :  { %4269 = vmatmul.msk.bf16.gmra.mxu0 %vm248_vm0, %v6075_v26 }
  0x3a   :  { %851 = vmatpush.bf16.msra.mxu2 %v6139_v6 }
  0x3e   :  { %852 = vmatpush.bf16.msra.mxu2 %v6138_v10 }
  0x42   :  { %853 = vmatpush.bf16.msra.mxu2 %v6137_v14 }
  0x44   :  { %4281 = vmatmul.msk.bf16.gmra.mxu3 %vm248_vm0, %v6075_v26  ;;  %4287 = vmatmul.msk.bf16.vlgmr.msrb.gmra.mxu1 %vm248_vm0, %v6592_v47 }
  0x45   :  { %4278 = vmatmul.msk.bf16.gmra.mxu2 %vm248_vm0, %v6572_v38 }
  0x46   :  { %854 = vmatpush.bf16.msra.mxu2 %v6136_v18 }
  0x47   :  { %4270 = vmatmul.msk.bf16.gmra.mxu0 %vm248_vm0, %v6572_v38 }
  0x54   :  { %4282 = vmatmul.msk.bf16.gmra.mxu3 %vm248_vm0, %v6572_v38  ;;  %4288 = vmatmul.msk.bf16.gmra.mxu1 %vm248_vm0, %v6647_v7 }
  0x55   :  { %4291 = vmatmul.msk.bf16.vlgmr.msrb.gmra.mxu2 %vm248_vm0, %v6592_v47 }
  0x56   :  { %1099 = vmatpush.bf16.msrb.mxu2 %v6179_v20 }
  0x57   :  { %4283 = vmatmul.msk.bf16.vlgmr.msrb.gmra.mxu0 %vm248_vm0, %v6592_v47 }
  0x5a   :  { %1100 = vmatpush.bf16.msrb.mxu2 %v6178_v25 }
  0x5e   :  { %1101 = vmatpush.bf16.msrb.mxu2 %v6177_v30 }
  0x62   :  { %1102 = vmatpush.bf16.msrb.mxu2 %v6176_v34 }
  0x64   :  { %4295 = vmatmul.msk.bf16.vlgmr.msra.gmra.mxu3 %vm248_vm0, %v6592_v47  ;;  %4289 = vmatmul.msk.bf16.gmra.mxu1 %vm248_vm0, %v6075_v26  ;;  %v6124_v47 = vld [vmem:[%s7974_s3 + $0x78] sm:$0xff] }
  0x65   :  { %4292 = vmatmul.msk.bf16.gmra.mxu2 %vm248_vm0, %v6647_v7  ;;  %724 = vmatpush.bf16.msra.mxu0 %v6124_v47 }
  0x66   :  { %1103 = vmatpush.bf16.msrb.mxu2 %v6175_v37 }
  0x67   :  { %4284 = vmatmul.msk.bf16.gmra.mxu0 %vm248_vm0, %v6647_v7 }
  0x69   :  { %725 = vmatpush.bf16.msra.mxu0 %v6123_v48 }
  0x6a   :  { %1104 = vmatpush.bf16.msrb.mxu2 %v6174_v43  ;;  %v6213_v43 = vld [vmem:[%s7974_s3 + $0x340] sm:$0xff] }
  0x6d   :  { %726 = vmatpush.bf16.msra.mxu0 %v6122_v52 }
  0x6e   :  { %1105 = vmatpush.bf16.msrb.mxu2 %v6173_v46 }
  0x71   :  { %727 = vmatpush.bf16.msra.mxu0 %v6121_v56 }
  0x72   :  { %1106 = vmatpush.bf16.msrb.mxu2 %v6172_v49 }
  0x74   :  { %4296 = vmatmul.msk.bf16.gmra.mxu3 %vm248_vm0, %v6647_v7  ;;  %4290 = vmatmul.msk.bf16.gmra.mxu1 %vm248_vm0, %v6572_v38  ;;  %v6161_v7 = vld [vmem:[%s7974_s3 + $0x1a0] sm:$0xff] }
  0x75   :  { %4293 = vmatmul.msk.bf16.gmra.mxu2 %vm248_vm0, %v6075_v26  ;;  %728 = vmatpush.bf16.msra.mxu0 %v6120_v60 }
  0x77   :  { %4285 = vmatmul.msk.bf16.gmra.mxu0 %vm248_vm0, %v6075_v26 }
  0x79   :  { %729 = vmatpush.bf16.msra.mxu0 %v6119_v0 }
  0x7d   :  { %730 = vmatpush.bf16.msra.mxu0 %v6118_v3  ;;  %v6180_v3 = vld [vmem:[%s7974_s3 + $0x238] sm:$0xff] }
  0x7e   :  { %1119 = vmatpush.bf16.msra.mxu3 %v6180_v3 }
  0x81   :  { %975 = vmatpush.bf16.msrb.mxu0 %v6161_v7 }
  0x84   :  { %4297 = vmatmul.msk.bf16.gmra.mxu3 %vm248_vm0, %v6075_v26 }
  0x85   :  { %4294 = vmatmul.msk.bf16.gmra.mxu2 %vm248_vm0, %v6572_v38  ;;  %976 = vmatpush.bf16.msrb.mxu0 %v6160_v11 }
  0x87   :  { %4286 = vmatmul.msk.bf16.gmra.mxu0 %vm248_vm0, %v6572_v38 }
  0x89   :  { %977 = vmatpush.bf16.msrb.mxu0 %v6159_v15 }
  0x8d   :  { %978 = vmatpush.bf16.msrb.mxu0 %v6158_v19  ;;  %v552_v0 = vpop.permute.xlu0 %551 }
  0x91   :  { %v6815_v59 = vpop.f32.mrf.mxu1  ;;  %979 = vmatpush.bf16.msrb.mxu0 %v6157_v23 }
  0x94   :  { %4298 = vmatmul.msk.bf16.gmra.mxu3 %vm248_vm0, %v6572_v38  ;;  %v6793_v51 = vpop.f32.mrf.mxu0  ;;  %v6126_v38 = vld [vmem:[%s7974_s3 + $0x88] sm:$0xff] }
  0x95   :  { %743 = vmatpush.bf16.msra.mxu1 %v6126_v38  ;;  %980 = vmatpush.bf16.msrb.mxu0 %v6156_v28  ;;  %v557_v28 = vpop.permute.xlu0 %556 }
  0x97   :  { %v6798_v53 = vpop.f32.mrf.mxu3 }
  0x98   :  { %v6800_v54 = vpop.f32.mrf.mxu2 }
  0x99   :  { %v493_v55 = vmax.f32 %v6793_v51, %v6800_v54  ;;  %v6840_v5 = vpop.f32.mrf.mxu1  ;;  %981 = vmatpush.bf16.msrb.mxu0 %v6155_v32  ;;  %995 = vmatpush.bf16.msrb.mxu1 %v6162_v50  ;;  %v6215_v51 = vld [vmem:[%s7974_s3 + $0x350] sm:$0xff]  ;;  %v6216_v54 = vld [vmem:[%s7974_s3 + $0x358] sm:$0xff] }
  0x9c   :  { %v6813_v58 = vpop.f32.mrf.mxu0 }
  0x9d   :  { %982 = vmatpush.bf16.msrb.mxu0 %v6154_v35 }
  0x9f   :  { %v6820_v61 = vpop.f32.mrf.mxu3 }
  0xa0   :  { %v6825_v63 = vpop.f32.mrf.mxu2 }
  0xa1   :  { %v6870_v17 = vpop.f32.mrf.mxu1  ;;  %v495_v18 = vmax.f32 %v6813_v58, %v6825_v63  ;;  %v6214_v58 = vld [vmem:[%s7974_s3 + $0x348] sm:$0xff] }
  0xa4   :  { %v6833_v2 = vpop.f32.mrf.mxu0 }
  0xa7   :  { %v6838_v4 = vpop.f32.mrf.mxu3 }
  0xa8   :  { %v6848_v8 = vpop.f32.mrf.mxu2  ;;  %v494_v32 = vmax.f32 %v6815_v59, %v6838_v4 }
  0xa9   :  { %v497_v9 = vmax.f32 %v6833_v2, %v6848_v8  ;;  %v6895_v27 = vpop.f32.mrf.mxu1  ;;  %v6196_v8 = vld [vmem:[%s7974_s3 + $0x2b8] sm:$0xff] }
  0xac   :  { %v6858_v12 = vpop.f32.mrf.mxu0 }
  0xaf   :  { %v6860_v13 = vpop.f32.mrf.mxu3 }
  0xb0   :  { %v6868_v16 = vpop.f32.mrf.mxu2  ;;  %v496_v3 = vmax.f32 %v6840_v5, %v6860_v13 }
  0xb1   :  { %v6923_v39 = vpop.f32.mrf.mxu1 }
  0xb4   :  { %v6881_v21 = vpop.f32.mrf.mxu0 }
  0xb7   :  { %v6883_v22 = vpop.f32.mrf.mxu3 }
  0xb8   :  { %v6888_v24 = vpop.f32.mrf.mxu2 }
  0xb9   :  { %v501_v26 = vmax.f32 %v6881_v21, %v6888_v24  ;;  %v6953_v38 = vpop.f32.mrf.mxu1  ;;  %v6282_v21 = vld [vmem:[%s7974_s3 + $0x568] sm:$0xff] }
  0xba   :  { %v6322_v24 = vld [vmem:[%s7974_s3 + $0x6a8] sm:$0xff] }
  0xbc   :  { %v6900_v29 = vpop.f32.mrf.mxu0 }
  0xbf   :  { %v6905_v31 = vpop.f32.mrf.mxu3 }
  0xc0   :  { %v6910_v33 = vpop.f32.mrf.mxu2 }
  0xc1   :  { %v415_v14 = vpop.f32.mrf.mxu1 }
  0xc4   :  { %v6918_v36 = vpop.f32.mrf.mxu0 }
  0xc7   :  { %v6925_v40 = vpop.f32.mrf.mxu3 }
  0xc8   :  { %v6927_v41 = vpop.f32.mrf.mxu2  ;;  %v502_v42 = vmax.f32 %v6923_v39, %v6925_v40  ;;  %v572_v39 = vpop.permute.xlu2 %571  ;;  %v6228_v40 = vld [vmem:[%s7974_s3 + $0x3b8] sm:$0xff] }
  0xc9   :  { %v505_v44 = vmax.f32 %v6918_v36, %v6927_v41  ;;  %v417_v35 = vpop.f32.mrf.mxu1  ;;  %v6340_v41 = vld [vmem:[%s7974_s3 + $0x738] sm:$0xff] }
  0xcc   :  { %v6936_v45 = vpop.f32.mrf.mxu0 }
  0xcf   :  { %v6941_v47 = vpop.f32.mrf.mxu3 }
  0xd0   :  { %v6943_v48 = vpop.f32.mrf.mxu2 }
  0xd4   :  { %v386_v52 = vpop.f32.mrf.mxu0 }
  0xd7   :  { %v6951_v56 = vpop.f32.mrf.mxu3 }
  0xd8   :  { %v506_v57 = vmax.f32 %v6798_v53, %v6951_v56  ;;  %v444_v60 = vpop.f32.mrf.mxu2  ;;  %v6395_v53 = vld [vmem:[%s7974_s3 + $0x8f0] sm:$0xff]  ;;  %v582_v56 = vpop.permute.xlu0 %581 }
  0xd9   :  { %v509_v62 = vmax.f32 %v386_v52, %v444_v60 }
  0xdb   :  { %v525_v1 = vmax.f32 %v493_v55, %v509_v62  ;;  %v6212_v62 = vld [vmem:[%s7974_s3 + $0x338] sm:$0xff] }
  0xdc   :  { %v388_v7 = vpop.f32.mrf.mxu0 }
  0xdd   :  { %v589_v6 = vadd.f32 %v552_v0, %v525_v1 }
  0xdf   :  { %v605_v10 = vmax.f32 %v589_v6, 0.0  ;;  %v6963_v11 = vpop.f32.mrf.mxu3 }
  0xe0   :  { %v446_v15 = vpop.f32.mrf.mxu2 }
  0xe1   :  { %v6967_v19 = vpack.c.bf16 %v605_v10, %v605_v10  ;;  %v511_v20 = vmax.f32 %v388_v7, %v446_v15  ;;  %v6197_v15 = vld [vmem:[%s7974_s3 + $0x2c0] sm:$0xff] }
  0xe3   :  { %v527_v55 = vmax.f32 %v495_v18, %v511_v20  ;;  %v662_v23 = vrot.slane %v6967_v19, 1  ;;  %v787_v25 = vrot.slane %v6967_v19, 3  ;;  %v6211_v18 = vld [vmem:[%s7974_s3 + $0x330] sm:$0xff]  ;;  %v420_v20 = vpop.f32.mrf.mxu1 }
  0xe4   :  { %v391_v49 = vpop.f32.mrf.mxu0 }
  0xe5   :  { %731 = vmatmul.bf16.vlgmr.msra.gmra.mxu0 %v662_v23  ;;  %855 = vmatmul.bf16.vlgmr.msra.gmra.mxu2 %v787_v25  ;;  %v591_v63 = vadd.f32 %v557_v28, %v527_v55  ;;  %v6198_v55 = vld [vmem:[%s7974_s3 + $0x2c8] sm:$0xff]  ;;  %v562_v23 = vpop.permute.xlu1 %561 }
  0xe6   :  { %1351 = vmatpush.bf16.msra.mxu0 %v6215_v51  ;;  %1371 = vmatpush.bf16.msra.mxu2 %v6216_v54  ;;  %v6251_v54 = vld [vmem:[%s7974_s3 + $0x470] sm:$0xff] }
  0xe7   :  { %v473_v30 = vpop.f32.mrf.mxu3  ;;  %v607_v46 = vmax.f32 %v591_v63, 0.0  ;;  %v6250_v63 = vld [vmem:[%s7974_s3 + $0x468] sm:$0xff] }
  0xe8   :  { %v510_v34 = vmax.f32 %v415_v14, %v473_v30  ;;  %v449_v50 = vpop.f32.mrf.mxu2 }
  0xe9   :  { %v6988_v1 = vpack.c.bf16 %v607_v46, %v607_v46  ;;  %v513_v59 = vmax.f32 %v391_v49, %v449_v50  ;;  %v6249_v46 = vld [vmem:[%s7974_s3 + $0x460] sm:$0xff] }
  0xea   :  { %v526_v37 = vmax.f32 %v494_v32, %v510_v34  ;;  %1352 = vmatpush.bf16.msra.mxu0 %v6214_v58 }
  0xeb   :  { %v529_v5 = vmax.f32 %v497_v9, %v513_v59  ;;  %v915_v13 = vrot.slane %v6988_v1, 1  ;;  %v1039_v51 = vrot.slane %v6988_v1, 3  ;;  %v6210_v9 = vld [vmem:[%s7974_s3 + $0x328] sm:$0xff]  ;;  %v6208_v59 = vld [vmem:[%s7974_s3 + $0x318] sm:$0xff] }
  0xec   :  { %v590_v52 = vadd.f32 %v552_v0, %v526_v37  ;;  %v6209_v37 = vld [vmem:[%s7974_s3 + $0x320] sm:$0xff]  ;;  %v393_v49 = vpop.f32.mrf.mxu0 }
  0xed   :  { %v593_v25 = vadd.f32 %v562_v23, %v529_v5 }
  0xee   :  { %v606_v60 = vmax.f32 %v590_v52, 0.0  ;;  %1353 = vmatpush.bf16.msra.mxu0 %v6213_v43 }
  0xef   :  { %v475_v4 = vpop.f32.mrf.mxu3  ;;  %v609_v43 = vmax.f32 %v593_v25, 0.0 }
  0xf0   :  { %v6992_v6 = vpack.c.bf16 %v606_v60, %v606_v60  ;;  %v512_v7 = vmax.f32 %v417_v35, %v475_v4  ;;  %v6195_v35 = vld [vmem:[%s7974_s3 + $0x2b0] sm:$0xff]  ;;  %v451_v50 = vpop.f32.mrf.mxu2 }
  0xf1   :  { %v7043_v4 = vpack.c.bf16 %v609_v43, %v609_v43 }
  0xf2   :  { %v528_v10 = vmax.f32 %v496_v3, %v512_v7  ;;  %1354 = vmatpush.bf16.msra.mxu0 %v6212_v62  ;;  %v663_v0 = vrot.slane %v6992_v6, 1  ;;  %v788_v14 = vrot.slane %v6992_v6, 3  ;;  %v6194_v62 = vld [vmem:[%s7974_s3 + $0x2a8] sm:$0xff]  ;;  %v6248_v7 = vld [vmem:[%s7974_s3 + $0x458] sm:$0xff] }
  0xf4   :  { %4353 = vmatmul.msk.bf16.vlgmr.msra.gmra.mxu1 %vm719_vm1, %v663_v0  ;;  %4426 = vmatmul.msk.bf16.vlgmr.msrb.gmra.mxu3 %vm719_vm1, %v788_v14  ;;  %v592_v2 = vadd.f32 %v557_v28, %v528_v10  ;;  %v498_v28 = vmax.f32 %v6870_v17, %v6883_v22  ;;  %v422_v22 = vpop.f32.mrf.mxu1  ;;  %v6252_v10 = vld [vmem:[%s7974_s3 + $0x478] sm:$0xff]  ;;  %v515_v0 = vmax.f32 %v393_v49, %v451_v50  ;;  %v6190_v50 = vld [vmem:[%s7974_s3 + $0x288] sm:$0xff] }
  0xf5   :  { %983 = vmatmul.bf16.vlgmr.msrb.gmra.mxu0 %v915_v13  ;;  %1107 = vmatmul.bf16.vlgmr.msrb.gmra.mxu2 %v1039_v51 }
  0xf6   :  { %1227 = vmatpush.bf16.msra.mxu1 %v6197_v15  ;;  %1355 = vmatpush.bf16.msra.mxu0 %v6211_v18  ;;  %v608_v32 = vmax.f32 %v592_v2, 0.0  ;;  %v500_v18 = vmax.f32 %v6895_v27, %v6905_v31  ;;  %v6287_v31 = vld [vmem:[%s7974_s3 + $0x590] sm:$0xff]  ;;  %v567_v2 = vpop.permute.xlu1 %566 }
  0xf7   :  { %1603 = vmatpush.bf16.msrb.mxu2 %v6251_v54  ;;  %v478_v58 = vpop.f32.mrf.mxu3  ;;  %1247 = vmatpush.bf16.msrb.mxu3 %v6198_v55  ;;  %v6193_v54 = vld [vmem:[%s7974_s3 + $0x2a0] sm:$0xff] }
  0xf8   :  { %v514_v30 = vmax.f32 %v420_v20, %v478_v58  ;;  %v7035_v52 = vpack.c.bf16 %v608_v32, %v608_v32  ;;  %v499_v20 = vmax.f32 %v6858_v12, %v6868_v16  ;;  %v6233_v55 = vld [vmem:[%s7974_s3 + $0x3e0] sm:$0xff]  ;;  %v1291_v12 = vrot.slane %v7043_v4, 3  ;;  %v6247_v16 = vld [vmem:[%s7974_s3 + $0x450] sm:$0xff]  ;;  %v6246_v58 = vld [vmem:[%s7974_s3 + $0x448] sm:$0xff]  ;;  %v454_v49 = vpop.f32.mrf.mxu2 }
  0xf9   :  { %v6231_v32 = vld [vmem:[%s7974_s3 + $0x3d0] sm:$0xff] }
  0xfa   :  { %v530_v34 = vmax.f32 %v498_v28, %v514_v30  ;;  %1228 = vmatpush.bf16.msra.mxu1 %v6196_v8  ;;  %1356 = vmatpush.bf16.msra.mxu0 %v6210_v9  ;;  %v916_v5 = vrot.slane %v7035_v52, 1  ;;  %v1040_v13 = vrot.slane %v7035_v52, 3  ;;  %v6192_v8 = vld [vmem:[%s7974_s3 + $0x298] sm:$0xff]  ;;  %v6191_v30 = vld [vmem:[%s7974_s3 + $0x290] sm:$0xff] }
  0xfb   :  { %1604 = vmatpush.bf16.msrb.mxu2 %v6250_v63  ;;  %v6232_v9 = vld [vmem:[%s7974_s3 + $0x3d8] sm:$0xff]  ;;  %v6286_v63 = vld [vmem:[%s7974_s3 + $0x588] sm:$0xff] }
  0xfc   :  { %v594_v17 = vadd.f32 %v562_v23, %v530_v34  ;;  %v531_v23 = vmax.f32 %v499_v20, %v515_v0  ;;  %v6234_v0 = vld [vmem:[%s7974_s3 + $0x3e8] sm:$0xff]  ;;  %v6229_v20 = vld [vmem:[%s7974_s3 + $0x3c0] sm:$0xff] }
  0xfe   :  { %v610_v60 = vmax.f32 %v594_v17, 0.0  ;;  %1229 = vmatpush.bf16.msra.mxu1 %v6195_v35  ;;  %1357 = vmatpush.bf16.msra.mxu0 %v6209_v37  ;;  %v595_v28 = vadd.f32 %v567_v2, %v531_v23  ;;  %v6245_v35 = vld [vmem:[%s7974_s3 + $0x440] sm:$0xff] }
  0xff   :  { %1605 = vmatpush.bf16.msrb.mxu2 %v6249_v46  ;;  %v480_v3 = vpop.f32.mrf.mxu3  ;;  %v6285_v37 = vld [vmem:[%s7974_s3 + $0x580] sm:$0xff]  ;;  %v425_v46 = vpop.f32.mrf.mxu1 }
 0x100   :  { %v7051_v14 = vpack.c.bf16 %v610_v60, %v610_v60  ;;  %v516_v15 = vmax.f32 %v422_v22, %v480_v3  ;;  %v611_v43 = vmax.f32 %v595_v28, 0.0  ;;  %v396_v22 = vpop.f32.mrf.mxu0  ;;  %v6230_v60 = vld [vmem:[%s7974_s3 + $0x3c8] sm:$0xff]  ;;  %v6284_v3 = vld [vmem:[%s7974_s3 + $0x578] sm:$0xff] }
 0x102   :  { %1230 = vmatpush.bf16.msra.mxu1 %v6194_v62  ;;  %1358 = vmatpush.bf16.msra.mxu0 %v6208_v59  ;;  %v1292_v51 = vrot.slane %v7051_v14, 3  ;;  %v532_v27 = vmax.f32 %v500_v18, %v516_v15  ;;  %v6244_v59 = vld [vmem:[%s7974_s3 + $0x438] sm:$0xff]  ;;  %v517_v15 = vmax.f32 %v396_v22, %v454_v49  ;;  %v1168_v18 = vrot.slane %v7051_v14, 1 }
 0x103   :  { %1606 = vmatpush.bf16.msrb.mxu2 %v6248_v7  ;;  %v7114_v7 = vpack.c.bf16 %v611_v43, %v611_v43  ;;  %v6270_v43 = vld [vmem:[%s7974_s3 + $0x508] sm:$0xff]  ;;  %v6320_v22 = vld [vmem:[%s7974_s3 + $0x698] sm:$0xff] }
 0x104   :  { %4499 = vmatmul.msk.bf16.vlgmr.msrb.gmra.mxu1 %vm719_vm1, %v916_v5  ;;  %4572 = vmatmul.msk.bf16.vlgmr.msra.gmra.mxu3 %vm719_vm1, %v1040_v13  ;;  %v596_v25 = vadd.f32 %v567_v2, %v532_v27  ;;  %v1167_v5 = vrot.slane %v7043_v4, 1  ;;  %v6227_v2 = vld [vmem:[%s7974_s3 + $0x3b0] sm:$0xff] }
 0x105   :  { %1359 = vmatmul.bf16.vlgmr.msra.gmra.mxu0 %v1291_v12  ;;  %4718 = vmatmul.msk.bf16.vlgmr.msra.gmra.mxu2 %vm719_vm1, %v1292_v51  ;;  %v6288_v51 = vld [vmem:[%s7974_s3 + $0x598] sm:$0xff]  ;;  %v1543_v27 = vrot.slane %v7114_v7, 3  ;;  %v6283_v12 = vld [vmem:[%s7974_s3 + $0x570] sm:$0xff] }
 0x106   :  { %1623 = vmatpush.bf16.msrb.mxu0 %v6252_v10  ;;  %1231 = vmatpush.bf16.msra.mxu1 %v6193_v54  ;;  %v612_v34 = vmax.f32 %v596_v25, 0.0  ;;  %v6269_v54 = vld [vmem:[%s7974_s3 + $0x500] sm:$0xff] }
 0x107   :  { %1479 = vmatpush.bf16.msra.mxu3 %v6233_v55  ;;  %1607 = vmatpush.bf16.msrb.mxu2 %v6247_v16  ;;  %v483_v17 = vpop.f32.mrf.mxu3  ;;  %v6323_v16 = vld [vmem:[%s7974_s3 + $0x6b0] sm:$0xff]  ;;  %v6281_v25 = vld [vmem:[%s7974_s3 + $0x560] sm:$0xff] }
 0x108   :  { %v7106_v62 = vpack.c.bf16 %v612_v34, %v612_v34  ;;  %v518_v10 = vmax.f32 %v425_v46, %v483_v17  ;;  %v398_v28 = vpop.f32.mrf.mxu0  ;;  %v427_v34 = vpop.f32.mrf.mxu1  ;;  %v6280_v17 = vld [vmem:[%s7974_s3 + $0x558] sm:$0xff] }
 0x10a   :  { %1855 = vmatpush.bf16.msra.mxu0 %v6287_v31  ;;  %1232 = vmatpush.bf16.msra.mxu1 %v6192_v8  ;;  %v1544_v13 = vrot.slane %v7106_v62, 3  ;;  %v534_v55 = vmax.f32 %v502_v42, %v518_v10  ;;  %v533_v31 = vmax.f32 %v501_v26, %v517_v15  ;;  %v6268_v42 = vld [vmem:[%s7974_s3 + $0x4f8] sm:$0xff]  ;;  %v6267_v8 = vld [vmem:[%s7974_s3 + $0x4f0] sm:$0xff]  ;;  %v1419_v10 = vrot.slane %v7114_v7, 1  ;;  %v6265_v15 = vld [vmem:[%s7974_s3 + $0x4e0] sm:$0xff] }
 0x10b   :  { %1480 = vmatpush.bf16.msra.mxu3 %v6232_v9  ;;  %1608 = vmatpush.bf16.msrb.mxu2 %v6246_v58  ;;  %v6321_v58 = vld [vmem:[%s7974_s3 + $0x6a0] sm:$0xff] }
 0x10c   :  { %v598_v23 = vadd.f32 %v572_v39, %v534_v55  ;;  %v597_v26 = vadd.f32 %v572_v39, %v533_v31  ;;  %v6304_v55 = vld [vmem:[%s7974_s3 + $0x618] sm:$0xff]  ;;  %v6263_v39 = vld [vmem:[%s7974_s3 + $0x4d0] sm:$0xff] }
 0x10e   :  { %1856 = vmatpush.bf16.msra.mxu0 %v6286_v63  ;;  %1233 = vmatpush.bf16.msra.mxu1 %v6191_v30  ;;  %v614_v9 = vmax.f32 %v598_v23, 0.0  ;;  %v613_v63 = vmax.f32 %v597_v26, 0.0  ;;  %v456_v30 = vpop.f32.mrf.mxu2 }
 0x10f   :  { %1481 = vmatpush.bf16.msra.mxu3 %v6231_v32  ;;  %1609 = vmatpush.bf16.msrb.mxu2 %v6245_v35  ;;  %v6226_v32 = vld [vmem:[%s7974_s3 + $0x3a8] sm:$0xff]  ;;  %v485_v35 = vpop.f32.mrf.mxu3 }
 0x110   :  { %v7179_v46 = vpack.c.bf16 %v614_v9, %v614_v9  ;;  %v7187_v49 = vpack.c.bf16 %v613_v63, %v613_v63  ;;  %v430_v26 = vpop.f32.mrf.mxu1  ;;  %v6316_v63 = vld [vmem:[%s7974_s3 + $0x678] sm:$0xff] }
 0x112   :  { %1857 = vmatpush.bf16.msra.mxu0 %v6285_v37  ;;  %1234 = vmatpush.bf16.msra.mxu1 %v6190_v50  ;;  %v6266_v37 = vld [vmem:[%s7974_s3 + $0x4e8] sm:$0xff]  ;;  %v519_v50 = vmax.f32 %v398_v28, %v456_v30 }
 0x113   :  { %1482 = vmatpush.bf16.msra.mxu3 %v6230_v60  ;;  %1610 = vmatpush.bf16.msrb.mxu2 %v6244_v59  ;;  %v520_v60 = vmax.f32 %v427_v34, %v485_v35  ;;  %v6324_v59 = vld [vmem:[%s7974_s3 + $0x6b8] sm:$0xff] }
 0x114   :  { %4645 = vmatmul.msk.bf16.vlgmr.msrb.gmra.mxu3 %vm719_vm1, %v1168_v18  ;;  %v504_v18 = vmax.f32 %v6953_v38, %v6941_v47  ;;  %v6359_v47 = vld [vmem:[%s7974_s3 + $0x7d0] sm:$0xff]  ;;  %v577_v38 = vpop.permute.xlu2 %576 }
 0x115   :  { %1235 = vmatmul.bf16.vlgmr.msra.gmra.mxu1 %v1167_v5  ;;  %4864 = vmatmul.msk.bf16.vlgmr.msrb.gmra.mxu0 %vm719_vm1, %v1544_v13  ;;  %v1795_v5 = vrot.slane %v7187_v49, 3 }
 0x116   :  { %1858 = vmatpush.bf16.msra.mxu0 %v6284_v3  ;;  %1499 = vmatpush.bf16.msrb.mxu1 %v6234_v0  ;;  %v503_v3 = vmax.f32 %v6900_v29, %v6910_v33  ;;  %v1420_v0 = vrot.slane %v7106_v62, 1  ;;  %v6305_v29 = vld [vmem:[%s7974_s3 + $0x620] sm:$0xff]  ;;  %v6319_v33 = vld [vmem:[%s7974_s3 + $0x690] sm:$0xff]  ;;  %v459_v9 = vpop.f32.mrf.mxu2 }
 0x117   :  { %1611 = vmatmul.bf16.vlgmr.msrb.gmra.mxu2 %v1543_v27  ;;  %1483 = vmatpush.bf16.msra.mxu3 %v6229_v20  ;;  %v1796_v20 = vrot.slane %v7179_v46, 3  ;;  %v6318_v27 = vld [vmem:[%s7974_s3 + $0x688] sm:$0xff] }
 0x118   :  { %1875 = vmatpush.bf16.msra.mxu2 %v6288_v51  ;;  %v535_v13 = vmax.f32 %v503_v3, %v519_v50  ;;  %v536_v51 = vmax.f32 %v504_v18, %v520_v60  ;;  %v6301_v50 = vld [vmem:[%s7974_s3 + $0x600] sm:$0xff] }
 0x119   :  { %v6341_v3 = vld [vmem:[%s7974_s3 + $0x740] sm:$0xff] }
 0x11a   :  { %1731 = vmatpush.bf16.msra.mxu1 %v6269_v54  ;;  %1859 = vmatpush.bf16.msra.mxu0 %v6283_v12  ;;  %v6264_v54 = vld [vmem:[%s7974_s3 + $0x4d8] sm:$0xff]  ;;  %v599_v12 = vadd.f32 %v577_v38, %v535_v13  ;;  %v600_v31 = vadd.f32 %v577_v38, %v536_v51  ;;  %v6353_v13 = vld [vmem:[%s7974_s3 + $0x7a0] sm:$0xff]  ;;  %v432_v51 = vpop.f32.mrf.mxu1 }
 0x11b   :  { %1484 = vmatpush.bf16.msra.mxu3 %v6228_v40  ;;  %v6303_v40 = vld [vmem:[%s7974_s3 + $0x610] sm:$0xff]  ;;  %v6393_v38 = vld [vmem:[%s7974_s3 + $0x8e0] sm:$0xff] }
 0x11c   :  { %2107 = vmatpush.bf16.msrb.mxu2 %v6323_v16  ;;  %v6358_v16 = vld [vmem:[%s7974_s3 + $0x7c8] sm:$0xff]  ;;  %v615_v23 = vmax.f32 %v599_v12, 0.0 }
 0x11d   :  { %v6298_v12 = vld [vmem:[%s7974_s3 + $0x5e8] sm:$0xff] }
 0x11e   :  { %1732 = vmatpush.bf16.msra.mxu1 %v6268_v42  ;;  %1860 = vmatpush.bf16.msra.mxu0 %v6282_v21  ;;  %v6317_v42 = vld [vmem:[%s7974_s3 + $0x680] sm:$0xff]  ;;  %v7247_v28 = vpack.c.bf16 %v615_v23, %v615_v23  ;;  %v6392_v23 = vld [vmem:[%s7974_s3 + $0x8d8] sm:$0xff] }
 0x11f   :  { %1485 = vmatpush.bf16.msra.mxu3 %v6227_v2  ;;  %v6357_v21 = vld [vmem:[%s7974_s3 + $0x7c0] sm:$0xff]  ;;  %v488_v2 = vpop.f32.mrf.mxu3 }
 0x120   :  { %2108 = vmatpush.bf16.msrb.mxu2 %v6322_v24  ;;  %v616_v24 = vmax.f32 %v600_v31, 0.0  ;;  %v522_v30 = vmax.f32 %v430_v26, %v488_v2  ;;  %v2047_v60 = vrot.slane %v7247_v28, 3  ;;  %v6338_v31 = vld [vmem:[%s7974_s3 + $0x728] sm:$0xff] }
 0x121   :  { %v6342_v2 = vld [vmem:[%s7974_s3 + $0x748] sm:$0xff] }
 0x122   :  { %1733 = vmatpush.bf16.msra.mxu1 %v6267_v8  ;;  %1861 = vmatpush.bf16.msra.mxu0 %v6281_v25  ;;  %v401_v8 = vpop.f32.mrf.mxu0  ;;  %v6262_v25 = vld [vmem:[%s7974_s3 + $0x4c8] sm:$0xff]  ;;  %v7252_v35 = vpack.c.bf16 %v616_v24, %v616_v24  ;;  %v508_v24 = vmax.f32 %v6820_v61, %v6963_v11  ;;  %v6396_v61 = vld [vmem:[%s7974_s3 + $0x8f8] sm:$0xff]  ;;  %v6337_v11 = vld [vmem:[%s7974_s3 + $0x720] sm:$0xff] }
 0x123   :  { %1486 = vmatpush.bf16.msra.mxu3 %v6226_v32  ;;  %v6356_v32 = vld [vmem:[%s7974_s3 + $0x7b8] sm:$0xff]  ;;  %v521_v34 = vmax.f32 %v401_v8, %v459_v9  ;;  %v507_v8 = vmax.f32 %v6936_v45, %v6943_v48  ;;  %v1923_v9 = vrot.slane %v7247_v28, 1  ;;  %v6377_v48 = vld [vmem:[%s7974_s3 + $0x860] sm:$0xff] }
 0x124   :  { %2109 = vmatpush.bf16.msrb.mxu2 %v6321_v58  ;;  %v6302_v58 = vld [vmem:[%s7974_s3 + $0x608] sm:$0xff]  ;;  %v1924_v26 = vrot.slane %v7252_v35, 1 }
 0x125   :  { %4791 = vmatmul.msk.bf16.vlgmr.msrb.gmra.mxu1 %vm719_vm1, %v1420_v0  ;;  %v537_v0 = vmax.f32 %v505_v44, %v521_v34  ;;  %v6354_v44 = vld [vmem:[%s7974_s3 + $0x7a8] sm:$0xff]  ;;  %v587_v34 = vpop.permute.xlu1 %586 }
 0x126   :  { %1734 = vmatpush.bf16.msra.mxu1 %v6266_v37  ;;  %1862 = vmatpush.bf16.msra.mxu0 %v6280_v17  ;;  %v6360_v37 = vld [vmem:[%s7974_s3 + $0x7d8] sm:$0xff]  ;;  %v6306_v17 = vld [vmem:[%s7974_s3 + $0x628] sm:$0xff] }
 0x127   :  { %1751 = vmatpush.bf16.msrb.mxu3 %v6270_v43  ;;  %5010 = vmatmul.msk.bf16.vlgmr.msra.gmra.mxu2 %vm719_vm1, %v1796_v20  ;;  %v1672_v43 = vrot.slane %v7179_v46, 1  ;;  %v601_v18 = vadd.f32 %v582_v56, %v537_v0  ;;  %v6394_v20 = vld [vmem:[%s7974_s3 + $0x8e8] sm:$0xff]  ;;  %v6389_v0 = vld [vmem:[%s7974_s3 + $0x8c0] sm:$0xff] }
 0x128   :  { %2110 = vmatpush.bf16.msrb.mxu2 %v6320_v22  ;;  %1487 = vmatmul.bf16.vlgmr.msra.gmra.mxu3 %v1419_v10  ;;  %v1671_v22 = vrot.slane %v7187_v49, 1  ;;  %v6355_v10 = vld [vmem:[%s7974_s3 + $0x7b0] sm:$0xff] }
 0x129   :  { %1863 = vmatmul.bf16.vlgmr.msra.gmra.mxu0 %v1795_v5  ;;  %v6339_v5 = vld [vmem:[%s7974_s3 + $0x730] sm:$0xff] }
 0x12a   :  { %2127 = vmatpush.bf16.msrb.mxu0 %v6324_v59  ;;  %1735 = vmatpush.bf16.msra.mxu1 %v6265_v15  ;;  %v538_v59 = vmax.f32 %v506_v57, %v522_v30  ;;  %v2048_v15 = vrot.slane %v7252_v35, 3  ;;  %v6300_v57 = vld [vmem:[%s7974_s3 + $0x5f8] sm:$0xff] }
 0x12b   :  { %1983 = vmatpush.bf16.msra.mxu3 %v6305_v29  ;;  %v6299_v29 = vld [vmem:[%s7974_s3 + $0x5f0] sm:$0xff] }
 0x12c   :  { %2111 = vmatpush.bf16.msrb.mxu2 %v6319_v33  ;;  %v602_v36 = vadd.f32 %v582_v56, %v538_v59  ;;  %v6335_v59 = vld [vmem:[%s7974_s3 + $0x710] sm:$0xff]  ;;  %v6334_v56 = vld [vmem:[%s7974_s3 + $0x708] sm:$0xff] }
 0x12e   :  { %2359 = vmatpush.bf16.msra.mxu0 %v6359_v47  ;;  %1736 = vmatpush.bf16.msra.mxu1 %v6264_v54  ;;  %v618_v33 = vmax.f32 %v602_v36, 0.0  ;;  %v617_v47 = vmax.f32 %v601_v18, 0.0  ;;  %v490_v54 = vpop.f32.mrf.mxu3  ;;  %v6374_v36 = vld [vmem:[%s7974_s3 + $0x848] sm:$0xff]  ;;  %v6131_v18 = vld [vmem:[%s7974_s3 + $0xb0] sm:$0xff] }
 0x12f   :  { %1984 = vmatpush.bf16.msra.mxu3 %v6304_v55  ;;  %v403_v55 = vpop.f32.mrf.mxu0 }
 0x130   :  { %2112 = vmatpush.bf16.msrb.mxu2 %v6318_v27  ;;  %v461_v27 = vpop.f32.mrf.mxu2 }
 0x132   :  { %2360 = vmatpush.bf16.msra.mxu0 %v6358_v16  ;;  %1737 = vmatpush.bf16.msra.mxu1 %v6263_v39  ;;  %v7311_v16 = vpack.c.bf16 %v618_v33, %v618_v33  ;;  %v6352_v39 = vld [vmem:[%s7974_s3 + $0x798] sm:$0xff] }
 0x133   :  { %1985 = vmatpush.bf16.msra.mxu3 %v6303_v40  ;;  %v7319_v40 = vpack.c.bf16 %v617_v47, %v617_v47  ;;  %v6373_v47 = vld [vmem:[%s7974_s3 + $0x840] sm:$0xff] }
 0x134   :  { %2113 = vmatpush.bf16.msrb.mxu2 %v6317_v42  ;;  %v524_v42 = vmax.f32 %v432_v51, %v490_v54  ;;  %v6116_v51 = vld [vmem:[%s7974_s3 + $0x38] sm:$0xff]  ;;  %v6130_v54 = vld [vmem:[%s7974_s3 + $0xa8] sm:$0xff] }
 0x135   :  { %v2299_v45 = vrot.slane %v7319_v40, 3 }
 0x136   :  { %2361 = vmatpush.bf16.msra.mxu0 %v6357_v21  ;;  %1738 = vmatpush.bf16.msra.mxu1 %v6262_v25  ;;  %v523_v21 = vmax.f32 %v403_v55, %v461_v27  ;;  %v2300_v25 = vrot.slane %v7311_v16, 3  ;;  %v6170_v55 = vld [vmem:[%s7974_s3 + $0x1e8] sm:$0xff]  ;;  %v6372_v27 = vld [vmem:[%s7974_s3 + $0x838] sm:$0xff] }
 0x137   :  { %1986 = vmatpush.bf16.msra.mxu3 %v6302_v58  ;;  %v540_v58 = vmax.f32 %v508_v24, %v524_v42  ;;  %v6371_v42 = vld [vmem:[%s7974_s3 + $0x830] sm:$0xff]  ;;  %v6168_v24 = vld [vmem:[%s7974_s3 + $0x1d8] sm:$0xff] }
 0x138   :  { %2114 = vmatpush.bf16.msrb.mxu2 %v6316_v63  ;;  %4937 = vmatmul.msk.bf16.vlgmr.msrb.gmra.mxu3 %vm719_vm1, %v1672_v43  ;;  %v6391_v63 = vld [vmem:[%s7974_s3 + $0x8d0] sm:$0xff]  ;;  %v539_v30 = vmax.f32 %v507_v8, %v523_v21  ;;  %v6128_v21 = vld [vmem:[%s7974_s3 + $0x98] sm:$0xff]  ;;  %v6113_v8 = vld [vmem:[%s7974_s3 + $0x20] sm:$0xff] }
 0x139   :  { %1739 = vmatmul.bf16.vlgmr.msra.gmra.mxu1 %v1671_v22  ;;  %5156 = vmatmul.msk.bf16.vlgmr.msrb.gmra.mxu0 %vm719_vm1, %v2048_v15  ;;  %v604_v43 = vadd.f32 %v587_v34, %v540_v58  ;;  %v6390_v22 = vld [vmem:[%s7974_s3 + $0x8c8] sm:$0xff]  ;;  %v2721_v58 = vrot.slane %v6992_v6, 2 }
 0x13a   :  { %2362 = vmatpush.bf16.msra.mxu0 %v6356_v32  ;;  %2003 = vmatpush.bf16.msrb.mxu1 %v6306_v17  ;;  %v6134_v32 = vld [vmem:[%s7974_s3 + $0xc8] sm:$0xff]  ;;  %v6376_v17 = vld [vmem:[%s7974_s3 + $0x858] sm:$0xff] }
 0x13b   :  { %2115 = vmatmul.bf16.vlgmr.msrb.gmra.mxu2 %v2047_v60  ;;  %1987 = vmatpush.bf16.msra.mxu3 %v6301_v50  ;;  %v603_v50 = vadd.f32 %v587_v34, %v539_v30  ;;  %v6133_v60 = vld [vmem:[%s7974_s3 + $0xc0] sm:$0xff]  ;;  %v2720_v30 = vrot.slane %v6967_v19, 2  ;;  %v6166_v34 = vld [vmem:[%s7974_s3 + $0x1c8] sm:$0xff] }
 0x13c   :  { %2379 = vmatpush.bf16.msra.mxu2 %v6360_v37  ;;  %v6336_v37 = vld [vmem:[%s7974_s3 + $0x718] sm:$0xff] }
 0x13d   :  { %v619_v15 = vmax.f32 %v603_v50, 0.0  ;;  %v6151_v50 = vld [vmem:[%s7974_s3 + $0x150] sm:$0xff] }
 0x13e   :  { %2235 = vmatpush.bf16.msra.mxu1 %v6341_v3  ;;  %2363 = vmatpush.bf16.msra.mxu0 %v6355_v10  ;;  %v620_v3 = vmax.f32 %v604_v43, 0.0  ;;  %v6375_v10 = vld [vmem:[%s7974_s3 + $0x850] sm:$0xff]  ;;  %v6206_v43 = vld [vmem:[%s7974_s3 + $0x308] sm:$0xff] }
 0x13f   :  { %1988 = vmatpush.bf16.msra.mxu3 %v6300_v57 }
 0x140   :  { %2611 = vmatpush.bf16.msrb.mxu2 %v6395_v53  ;;  %v6132_v53 = vld [vmem:[%s7974_s3 + $0xb8] sm:$0xff]  ;;  %v7379_v57 = vpack.c.bf16 %v620_v3, %v620_v3  ;;  %v6110_v3 = vld [vmem:[%s7974_s3 + $0x8] sm:$0xff] }
 0x142   :  { %2236 = vmatpush.bf16.msra.mxu1 %v6340_v41  ;;  %2364 = vmatpush.bf16.msra.mxu0 %v6354_v44  ;;  %v6388_v41 = vld [vmem:[%s7974_s3 + $0x8b8] sm:$0xff]  ;;  %v7387_v44 = vpack.c.bf16 %v619_v15, %v619_v15  ;;  %v2552_v33 = vrot.slane %v7379_v57, 3 }
 0x143   :  { %1989 = vmatpush.bf16.msra.mxu3 %v6299_v29  ;;  %v6378_v29 = vld [vmem:[%s7974_s3 + $0x868] sm:$0xff] }
 0x144   :  { %2612 = vmatpush.bf16.msrb.mxu2 %v6394_v20  ;;  %v2176_v20 = vrot.slane %v7311_v16, 1 }
 0x146   :  { %2237 = vmatpush.bf16.msra.mxu1 %v6339_v5  ;;  %2365 = vmatpush.bf16.msra.mxu0 %v6353_v13  ;;  %v2175_v5 = vrot.slane %v7319_v40, 1  ;;  %v6135_v13 = vld [vmem:[%s7974_s3 + $0xd0] sm:$0xff] }
 0x147   :  { %1990 = vmatpush.bf16.msra.mxu3 %v6298_v12  ;;  %v6115_v12 = vld [vmem:[%s7974_s3 + $0x30] sm:$0xff] }
 0x148   :  { %2613 = vmatpush.bf16.msrb.mxu2 %v6393_v38  ;;  %v2551_v38 = vrot.slane %v7387_v44, 3 }
 0x149   :  { %5083 = vmatmul.msk.bf16.vlgmr.msrb.gmra.mxu1 %vm719_vm1, %v1924_v26 }
 0x14a   :  { %2238 = vmatpush.bf16.msra.mxu1 %v6338_v31  ;;  %2366 = vmatpush.bf16.msra.mxu0 %v6352_v39  ;;  %v6129_v31 = vld [vmem:[%s7974_s3 + $0xa0] sm:$0xff] }
 0x14b   :  { %1991 = vmatmul.bf16.vlgmr.msra.gmra.mxu3 %v1923_v9  ;;  %5302 = vmatmul.msk.bf16.vlgmr.msra.gmra.mxu2 %vm719_vm1, %v2300_v25  ;;  %v6169_v39 = vld [vmem:[%s7974_s3 + $0x1e0] sm:$0xff]  ;;  %v6127_v9 = vld [vmem:[%s7974_s3 + $0x90] sm:$0xff] }
 0x14c   :  { %2614 = vmatpush.bf16.msrb.mxu2 %v6392_v23  ;;  %2255 = vmatpush.bf16.msrb.mxu3 %v6342_v2  ;;  %v6114_v23 = vld [vmem:[%s7974_s3 + $0x28] sm:$0xff]  ;;  %v6167_v25 = vld [vmem:[%s7974_s3 + $0x1d0] sm:$0xff] }
 0x14d   :  { %2367 = vmatmul.bf16.vlgmr.msra.gmra.mxu0 %v2299_v45  ;;  %v6370_v2 = vld [vmem:[%s7974_s3 + $0x828] sm:$0xff]  ;;  %v2427_v45 = vrot.slane %v7387_v44, 1 }
 0x14e   :  { %2631 = vmatpush.bf16.msrb.mxu0 %v6396_v61  ;;  %2239 = vmatpush.bf16.msra.mxu1 %v6337_v11  ;;  %v2428_v61 = vrot.slane %v7379_v57, 1  ;;  %v6117_v11 = vld [vmem:[%s7974_s3 + $0x40] sm:$0xff] }
 0x150   :  { %2487 = vmatpush.bf16.msra.mxu3 %v6377_v48  ;;  %2615 = vmatpush.bf16.msrb.mxu2 %v6391_v63  ;;  %v6171_v48 = vld [vmem:[%s7974_s3 + $0x1f0] sm:$0xff]  ;;  %v6112_v63 = vld [vmem:[%s7974_s3 + $0x18] sm:$0xff] }
 0x152   :  { %2780 = vmatpush.bf16.msra.mxu0 %v6134_v32  ;;  %2240 = vmatpush.bf16.msra.mxu1 %v6336_v37  ;;  %v6152_v32 = vld [vmem:[%s7974_s3 + $0x158] sm:$0xff] }
 0x154   :  { %2488 = vmatpush.bf16.msra.mxu3 %v6376_v17  ;;  %2616 = vmatpush.bf16.msrb.mxu2 %v6390_v22  ;;  %v6111_v22 = vld [vmem:[%s7974_s3 + $0x10] sm:$0xff] }
 0x156   :  { %2781 = vmatpush.bf16.msra.mxu0 %v6133_v60  ;;  %2241 = vmatpush.bf16.msra.mxu1 %v6335_v59  ;;  %v6165_v60 = vld [vmem:[%s7974_s3 + $0x1c0] sm:$0xff] }
 0x157   :  { %v6205_v59 = vld [vmem:[%s7974_s3 + $0x300] sm:$0xff] }
 0x158   :  { %2489 = vmatpush.bf16.msra.mxu3 %v6375_v10  ;;  %2617 = vmatpush.bf16.msrb.mxu2 %v6389_v0  ;;  %v6150_v10 = vld [vmem:[%s7974_s3 + $0x148] sm:$0xff]  ;;  %v6164_v0 = vld [vmem:[%s7974_s3 + $0x1b8] sm:$0xff] }
 0x15a   :  { %2782 = vmatpush.bf16.msra.mxu0 %v6132_v53  ;;  %2242 = vmatpush.bf16.msra.mxu1 %v6334_v56  ;;  %v6204_v53 = vld [vmem:[%s7974_s3 + $0x2f8] sm:$0xff] }
 0x15b   :  { %5229 = vmatmul.msk.bf16.vlgmr.msrb.gmra.mxu3 %vm719_vm1, %v2176_v20  ;;  %v6149_v20 = vld [vmem:[%s7974_s3 + $0x140] sm:$0xff] }
 0x15c   :  { %2490 = vmatpush.bf16.msra.mxu3 %v6374_v36  ;;  %2618 = vmatpush.bf16.msrb.mxu2 %v6388_v41 }
 0x15d   :  { %2243 = vmatmul.bf16.vlgmr.msra.gmra.mxu1 %v2175_v5  ;;  %5448 = vmatmul.msk.bf16.vlgmr.msrb.gmra.mxu0 %vm719_vm1, %v2552_v33  ;;  %v6203_v33 = vld [vmem:[%s7974_s3 + $0x2f0] sm:$0xff]  ;;  %v6153_v5 = vld [vmem:[%s7974_s3 + $0x160] sm:$0xff] }
 0x15e   :  { %2783 = vmatpush.bf16.msra.mxu0 %v6131_v18  ;;  %2507 = vmatpush.bf16.msrb.mxu1 %v6378_v29  ;;  %v6109_v18 = vld [vmem:[%s7974_s3] sm:$0xff]  ;;  %v6163_v29 = vld [vmem:[%s7974_s3 + $0x1b0] sm:$0xff] }
 0x15f   :  { %2619 = vmatmul.bf16.vlgmr.msrb.gmra.mxu2 %v2551_v38  ;;  %v6207_v38 = vld [vmem:[%s7974_s3 + $0x310] sm:$0xff] }
 0x160   :  { %2800 = vmatpush.bf16.msra.mxu2 %v6135_v13  ;;  %2491 = vmatpush.bf16.msra.mxu3 %v6373_v47  ;;  %v2890_v47 = vrot.slane %v7035_v52, 2 }
 0x162   :  { %2694 = vmatpush.bf16.msra.mxu1 %v6116_v51  ;;  %2784 = vmatpush.bf16.msra.mxu0 %v6130_v54  ;;  %v732_v26 = vpop.f32.mrf.mxu0  ;;  %v6148_v51 = vld [vmem:[%s7974_s3 + $0x138] sm:$0xff] }
 0x164   :  { %2949 = vmatpush.bf16.msrb.mxu2 %v6170_v55  ;;  %2492 = vmatpush.bf16.msra.mxu3 %v6372_v27  ;;  %v2889_v27 = vrot.slane %v6988_v1, 2 }
 0x166   :  { %2695 = vmatpush.bf16.msra.mxu1 %v6115_v12  ;;  %2785 = vmatpush.bf16.msra.mxu0 %v6129_v31  ;;  %v6188_v12 = vld [vmem:[%s7974_s3 + $0x278] sm:$0xff]  ;;  %v6202_v31 = vld [vmem:[%s7974_s3 + $0x2e8] sm:$0xff] }
 0x168   :  { %2950 = vmatpush.bf16.msrb.mxu2 %v6169_v39  ;;  %2493 = vmatpush.bf16.msra.mxu3 %v6371_v42  ;;  %v856_v37 = vpop.f32.mrf.mxu2  ;;  %v6242_v42 = vld [vmem:[%s7974_s3 + $0x428] sm:$0xff] }
 0x16a   :  { %2696 = vmatpush.bf16.msra.mxu1 %v6114_v23  ;;  %2786 = vmatpush.bf16.msra.mxu0 %v6128_v21  ;;  %v734_v17 = vpop.f32.mrf.mxu0  ;;  %v6201_v21 = vld [vmem:[%s7974_s3 + $0x2e0] sm:$0xff] }
 0x16c   :  { %2951 = vmatpush.bf16.msrb.mxu2 %v6168_v24  ;;  %2494 = vmatpush.bf16.msra.mxu3 %v6370_v2  ;;  %v6241_v24 = vld [vmem:[%s7974_s3 + $0x420] sm:$0xff]  ;;  %v6146_v2 = vld [vmem:[%s7974_s3 + $0x128] sm:$0xff] }
 0x16d   :  { %5375 = vmatmul.msk.bf16.vlgmr.msrb.gmra.mxu1 %vm719_vm1, %v2428_v61 }
 0x16e   :  { %2697 = vmatpush.bf16.msra.mxu1 %v6113_v8  ;;  %2787 = vmatpush.bf16.msra.mxu0 %v6127_v9  ;;  %v6186_v9 = vld [vmem:[%s7974_s3 + $0x268] sm:$0xff] }
 0x16f   :  { %2495 = vmatmul.bf16.vlgmr.msra.gmra.mxu3 %v2427_v45  ;;  %5522 = vmatmul.msk.bf16.vlgmr.msra.gmra.mxu2 %vm719_vm1, %v2721_v58 }
 0x170   :  { %2952 = vmatpush.bf16.msrb.mxu2 %v6167_v25  ;;  %2714 = vmatpush.bf16.msrb.mxu3 %v6117_v11  ;;  %v858_v15 = vpop.f32.mrf.mxu2  ;;  %v6200_v25 = vld [vmem:[%s7974_s3 + $0x2d8] sm:$0xff] }
 0x171   :  { %2788 = vmatmul.bf16.vlgmr.msra.gmra.mxu0 %v2720_v30  ;;  %v745_v56 = vpop.f32.mrf.mxu1  ;;  %v6240_v11 = vld [vmem:[%s7974_s3 + $0x418] sm:$0xff]  ;;  %v6199_v30 = vld [vmem:[%s7974_s3 + $0x2d0] sm:$0xff]  ;;  %v6238_v15 = vld [vmem:[%s7974_s3 + $0x408] sm:$0xff] }
 0x172   :  { %2969 = vmatpush.bf16.msrb.mxu0 %v6171_v48  ;;  %2698 = vmatpush.bf16.msra.mxu1 %v6112_v63  ;;  %v7500_v36 = vadd.f32 %v745_v56, %v732_v26  ;;  %v984_v41 = vpop.f32.mrf.mxu0  ;;  %v6145_v48 = vld [vmem:[%s7974_s3 + $0x120] sm:$0xff]  ;;  %v6278_v56 = vld [vmem:[%s7974_s3 + $0x548] sm:$0xff] }
 0x173   :  { %v6185_v63 = vld [vmem:[%s7974_s3 + $0x260] sm:$0xff] }
 0x174   :  { %2863 = vmatpush.bf16.msra.mxu3 %v6152_v32  ;;  %2953 = vmatpush.bf16.msrb.mxu2 %v6166_v34  ;;  %v6239_v32 = vld [vmem:[%s7974_s3 + $0x410] sm:$0xff] }
 0x176   :  { %3118 = vmatpush.bf16.msra.mxu0 %v6206_v43  ;;  %2699 = vmatpush.bf16.msra.mxu1 %v6111_v22  ;;  %v3059_v22 = vrot.slane %v7051_v14, 2 }
 0x177   :  { %v869_v13 = vpop.f32.mrf.mxu3 }
 0x178   :  { %2864 = vmatpush.bf16.msra.mxu3 %v6151_v50  ;;  %2954 = vmatpush.bf16.msrb.mxu2 %v6165_v60  ;;  %v7524_v54 = vadd.f32 %v869_v13, %v856_v37  ;;  %v1108_v55 = vpop.f32.mrf.mxu2  ;;  %v6189_v37 = vld [vmem:[%s7974_s3 + $0x280] sm:$0xff]  ;;  %v6243_v50 = vld [vmem:[%s7974_s3 + $0x430] sm:$0xff]  ;;  %v6184_v60 = vld [vmem:[%s7974_s3 + $0x258] sm:$0xff] }
 0x179   :  { %v747_v39 = vpop.f32.mrf.mxu1  ;;  %v6236_v13 = vld [vmem:[%s7974_s3 + $0x3f8] sm:$0xff] }
 0x17a   :  { %3119 = vmatpush.bf16.msra.mxu0 %v6205_v59  ;;  %2700 = vmatpush.bf16.msra.mxu1 %v6110_v3  ;;  %v986_v23 = vpop.f32.mrf.mxu0 }
 0x17b   :  { %v6225_v23 = vld [vmem:[%s7974_s3 + $0x3a0] sm:$0xff] }
 0x17c   :  { %2865 = vmatpush.bf16.msra.mxu3 %v6150_v10  ;;  %2955 = vmatpush.bf16.msrb.mxu2 %v6164_v0  ;;  %v3058_v10 = vrot.slane %v7043_v4, 2  ;;  %v6224_v0 = vld [vmem:[%s7974_s3 + $0x398] sm:$0xff] }
 0x17e   :  { %3120 = vmatpush.bf16.msra.mxu0 %v6204_v53  ;;  %2701 = vmatpush.bf16.msra.mxu1 %v6109_v18  ;;  %v6277_v18 = vld [vmem:[%s7974_s3 + $0x540] sm:$0xff] }
 0x17f   :  { %5485 = vmatmul.msk.bf16.vlgmr.msrb.gmra.mxu3 %vm719_vm1, %v6992_v6  ;;  %v6147_v6 = vld [vmem:[%s7974_s3 + $0x130] sm:$0xff]  ;;  %v871_v26 = vpop.f32.mrf.mxu3 }
 0x180   :  { %2866 = vmatpush.bf16.msra.mxu3 %v6149_v20  ;;  %2956 = vmatpush.bf16.msrb.mxu2 %v6163_v29  ;;  %v1110_v8 = vpop.f32.mrf.mxu2 }
 0x181   :  { %2702 = vmatmul.bf16.vlgmr.msra.gmra.mxu1 %v6967_v19  ;;  %5596 = vmatmul.msk.bf16.vlgmr.msrb.gmra.mxu0 %vm719_vm1, %v2890_v47  ;;  %v6187_v19 = vld [vmem:[%s7974_s3 + $0x270] sm:$0xff]  ;;  %v997_v61 = vpop.f32.mrf.mxu1 }
 0x182   :  { %3121 = vmatpush.bf16.msra.mxu0 %v6203_v33  ;;  %2883 = vmatpush.bf16.msrb.mxu1 %v6153_v5  ;;  %v7564_v58 = vadd.f32 %v997_v61, %v984_v41  ;;  %v1360_v45 = vpop.f32.mrf.mxu0  ;;  %v6237_v41 = vld [vmem:[%s7974_s3 + $0x400] sm:$0xff]  ;;  %v6182_v33 = vld [vmem:[%s7974_s3 + $0x248] sm:$0xff] }
 0x183   :  { %2957 = vmatmul.bf16.vlgmr.msrb.gmra.mxu2 %v2889_v27  ;;  %v6222_v5 = vld [vmem:[%s7974_s3 + $0x388] sm:$0xff]  ;;  %v6221_v27 = vld [vmem:[%s7974_s3 + $0x380] sm:$0xff] }
 0x184   :  { %3138 = vmatpush.bf16.msra.mxu2 %v6207_v38  ;;  %2867 = vmatpush.bf16.msra.mxu3 %v6148_v51  ;;  %v6276_v51 = vld [vmem:[%s7974_s3 + $0x538] sm:$0xff]  ;;  %v6274_v61 = vld [vmem:[%s7974_s3 + $0x528] sm:$0xff] }
 0x186   :  { %3032 = vmatpush.bf16.msra.mxu1 %v6188_v12  ;;  %3122 = vmatpush.bf16.msra.mxu0 %v6202_v31  ;;  %v6235_v12 = vld [vmem:[%s7974_s3 + $0x3f0] sm:$0xff] }
 0x187   :  { %v1121_v34 = vpop.f32.mrf.mxu3  ;;  %v6275_v31 = vld [vmem:[%s7974_s3 + $0x530] sm:$0xff] }
 0x188   :  { %3287 = vmatpush.bf16.msrb.mxu2 %v6242_v42  ;;  %2868 = vmatpush.bf16.msra.mxu3 %v6147_v6  ;;  %v7581_v43 = vadd.f32 %v1121_v34, %v1108_v55  ;;  %v1373_v17 = vpop.f32.mrf.mxu2  ;;  %v6181_v55 = vld [vmem:[%s7974_s3 + $0x240] sm:$0xff] }
 0x189   :  { %v7590_v59 = vadd.f32 %v1373_v17, %v1360_v45  ;;  %v999_v3 = vpop.f32.mrf.mxu1  ;;  %v6273_v45 = vld [vmem:[%s7974_s3 + $0x520] sm:$0xff]  ;;  %v6272_v17 = vld [vmem:[%s7974_s3 + $0x518] sm:$0xff] }
 0x18a   :  { %3033 = vmatpush.bf16.msra.mxu1 %v6187_v19  ;;  %3123 = vmatpush.bf16.msra.mxu0 %v6201_v21  ;;  %v1362_v53 = vpop.f32.mrf.mxu0  ;;  %v3228_v19 = vrot.slane %v7106_v62, 2  ;;  %v6279_v21 = vld [vmem:[%s7974_s3 + $0x550] sm:$0xff]  ;;  %v6257_v3 = vld [vmem:[%s7974_s3 + $0x4a0] sm:$0xff] }
 0x18c   :  { %3288 = vmatpush.bf16.msrb.mxu2 %v6241_v24  ;;  %2869 = vmatpush.bf16.msra.mxu3 %v6146_v2  ;;  %v6220_v24 = vld [vmem:[%s7974_s3 + $0x378] sm:$0xff] }
 0x18e   :  { %3034 = vmatpush.bf16.msra.mxu1 %v6186_v9  ;;  %3124 = vmatpush.bf16.msra.mxu0 %v6200_v25  ;;  %v3227_v9 = vrot.slane %v7114_v7, 2  ;;  %v6260_v25 = vld [vmem:[%s7974_s3 + $0x4b8] sm:$0xff] }
 0x18f   :  { %v1123_v20 = vpop.f32.mrf.mxu3 }
 0x190   :  { %3289 = vmatpush.bf16.msrb.mxu2 %v6240_v11  ;;  %2870 = vmatpush.bf16.msra.mxu3 %v6145_v48  ;;  %v1375_v29 = vpop.f32.mrf.mxu2  ;;  %v6314_v11 = vld [vmem:[%s7974_s3 + $0x668] sm:$0xff]  ;;  %v6315_v20 = vld [vmem:[%s7974_s3 + $0x670] sm:$0xff] }
 0x191   :  { %5559 = vmatmul.msk.bf16.vlgmr.msrb.gmra.mxu1 %vm719_vm1, %v7035_v52  ;;  %v6183_v52 = vld [vmem:[%s7974_s3 + $0x250] sm:$0xff]  ;;  %v6256_v29 = vld [vmem:[%s7974_s3 + $0x498] sm:$0xff] }
 0x192   :  { %3035 = vmatpush.bf16.msra.mxu1 %v6185_v63  ;;  %3125 = vmatpush.bf16.msra.mxu0 %v6199_v30  ;;  %v1236_v47 = vpop.f32.mrf.mxu1  ;;  %v1625_v38 = vpop.f32.mrf.mxu0  ;;  %v6313_v63 = vld [vmem:[%s7974_s3 + $0x660] sm:$0xff] }
 0x193   :  { %2871 = vmatmul.bf16.vlgmr.msra.gmra.mxu3 %v6988_v1  ;;  %5670 = vmatmul.msk.bf16.vlgmr.msra.gmra.mxu2 %vm719_vm1, %v3059_v22  ;;  %v6223_v1 = vld [vmem:[%s7974_s3 + $0x390] sm:$0xff]  ;;  %v6312_v22 = vld [vmem:[%s7974_s3 + $0x658] sm:$0xff] }
 0x194   :  { %3290 = vmatpush.bf16.msrb.mxu2 %v6239_v32  ;;  %3052 = vmatpush.bf16.msrb.mxu3 %v6189_v37  ;;  %v6218_v32 = vld [vmem:[%s7974_s3 + $0x368] sm:$0xff] }
 0x195   :  { %3126 = vmatmul.bf16.vlgmr.msra.gmra.mxu0 %v3058_v10  ;;  %v6258_v37 = vld [vmem:[%s7974_s3 + $0x4a8] sm:$0xff]  ;;  %v6271_v10 = vld [vmem:[%s7974_s3 + $0x510] sm:$0xff] }
 0x196   :  { %3307 = vmatpush.bf16.msrb.mxu0 %v6243_v50  ;;  %3036 = vmatpush.bf16.msra.mxu1 %v6184_v60  ;;  %v6217_v60 = vld [vmem:[%s7974_s3 + $0x360] sm:$0xff] }
 0x197   :  { %v1249_v39 = vpop.f32.mrf.mxu3 }
 0x198   :  { %3201 = vmatpush.bf16.msra.mxu3 %v6224_v0  ;;  %3291 = vmatpush.bf16.msrb.mxu2 %v6238_v15  ;;  %v7642_v42 = vadd.f32 %v1249_v39, %v1236_v47  ;;  %v6311_v0 = vld [vmem:[%s7974_s3 + $0x650] sm:$0xff] }
 0x19a   :  { %3456 = vmatpush.bf16.msra.mxu0 %v6278_v56  ;;  %3037 = vmatpush.bf16.msra.mxu1 %v6183_v52  ;;  %v1612_v6 = vpop.f32.mrf.mxu2  ;;  %v1238_v2 = vpop.f32.mrf.mxu1  ;;  %v6261_v52 = vld [vmem:[%s7974_s3 + $0x4c0] sm:$0xff] }
 0x19b   :  { %v7654_v26 = vadd.f32 %v1625_v38, %v1612_v6  ;;  %v1627_v8 = vpop.f32.mrf.mxu0  ;;  %v6350_v38 = vld [vmem:[%s7974_s3 + $0x788] sm:$0xff]  ;;  %v6308_v6 = vld [vmem:[%s7974_s3 + $0x638] sm:$0xff]  ;;  %v6293_v2 = vld [vmem:[%s7974_s3 + $0x5c0] sm:$0xff] }
 0x19c   :  { %3202 = vmatpush.bf16.msra.mxu3 %v6223_v1  ;;  %3292 = vmatpush.bf16.msrb.mxu2 %v6237_v41  ;;  %v6307_v8 = vld [vmem:[%s7974_s3 + $0x630] sm:$0xff] }
 0x19e   :  { %3457 = vmatpush.bf16.msra.mxu0 %v6277_v18  ;;  %3038 = vmatpush.bf16.msra.mxu1 %v6182_v33  ;;  %v3397_v18 = vrot.slane %v7179_v46, 2  ;;  %v3396_v33 = vrot.slane %v7187_v49, 2 }
 0x19f   :  { %v1251_v48 = vpop.f32.mrf.mxu3 }
 0x1a0   :  { %3203 = vmatpush.bf16.msra.mxu3 %v6222_v5  ;;  %3293 = vmatpush.bf16.msrb.mxu2 %v6236_v13  ;;  %v6296_v5 = vld [vmem:[%s7974_s3 + $0x5d8] sm:$0xff]  ;;  %v6310_v13 = vld [vmem:[%s7974_s3 + $0x648] sm:$0xff]  ;;  %v3566_v48 = vrot.slane %v7252_v35, 2 }
 0x1a2   :  { %3458 = vmatpush.bf16.msra.mxu0 %v6276_v51  ;;  %3039 = vmatpush.bf16.msra.mxu1 %v6181_v55  ;;  %v1614_v30 = vpop.f32.mrf.mxu2  ;;  %v1501_v34 = vpop.f32.mrf.mxu1  ;;  %v6309_v51 = vld [vmem:[%s7974_s3 + $0x640] sm:$0xff] }
 0x1a3   :  { %5633 = vmatmul.msk.bf16.vlgmr.msrb.gmra.mxu3 %vm719_vm1, %v7051_v14  ;;  %v6219_v14 = vld [vmem:[%s7974_s3 + $0x370] sm:$0xff]  ;;  %v6292_v30 = vld [vmem:[%s7974_s3 + $0x5b8] sm:$0xff] }
 0x1a4   :  { %3204 = vmatpush.bf16.msra.mxu3 %v6221_v27  ;;  %3294 = vmatpush.bf16.msrb.mxu2 %v6235_v12  ;;  %v6349_v27 = vld [vmem:[%s7974_s3 + $0x780] sm:$0xff] }
 0x1a5   :  { %3040 = vmatmul.bf16.vlgmr.msra.gmra.mxu1 %v7043_v4  ;;  %5744 = vmatmul.msk.bf16.vlgmr.msrb.gmra.mxu0 %vm719_vm1, %v3228_v19  ;;  %v6259_v4 = vld [vmem:[%s7974_s3 + $0x4b0] sm:$0xff]  ;;  %v6348_v19 = vld [vmem:[%s7974_s3 + $0x778] sm:$0xff] }
 0x1a6   :  { %3459 = vmatpush.bf16.msra.mxu0 %v6275_v31  ;;  %3221 = vmatpush.bf16.msrb.mxu1 %v6225_v23  ;;  %v1864_v50 = vpop.f32.mrf.mxu0  ;;  %v6254_v31 = vld [vmem:[%s7974_s3 + $0x488] sm:$0xff] }
 0x1a7   :  { %3295 = vmatmul.bf16.vlgmr.msrb.gmra.mxu2 %v3227_v9  ;;  %v6294_v23 = vld [vmem:[%s7974_s3 + $0x5c8] sm:$0xff] }
 0x1a8   :  { %3476 = vmatpush.bf16.msra.mxu2 %v6279_v21  ;;  %3205 = vmatpush.bf16.msra.mxu3 %v6220_v24  ;;  %v6253_v24 = vld [vmem:[%s7974_s3 + $0x480] sm:$0xff] }
 0x1aa   :  { %3370 = vmatpush.bf16.msra.mxu1 %v6260_v25  ;;  %3460 = vmatpush.bf16.msra.mxu0 %v6274_v61  ;;  %v1877_v56 = vpop.f32.mrf.mxu2  ;;  %v1503_v41 = vpop.f32.mrf.mxu1  ;;  %v6347_v25 = vld [vmem:[%s7974_s3 + $0x770] sm:$0xff] }
 0x1ab   :  { %v1488_v15 = vpop.f32.mrf.mxu3  ;;  %v7711_v1 = vadd.f32 %v1877_v56, %v1864_v50  ;;  %v6330_v56 = vld [vmem:[%s7974_s3 + $0x6e8] sm:$0xff] }
 0x1ac   :  { %3625 = vmatpush.bf16.msrb.mxu2 %v6314_v11  ;;  %3206 = vmatpush.bf16.msra.mxu3 %v6219_v14  ;;  %v7706_v53 = vadd.f32 %v1501_v34, %v1488_v15  ;;  %v6297_v14 = vld [vmem:[%s7974_s3 + $0x5e0] sm:$0xff]  ;;  %v6332_v34 = vld [vmem:[%s7974_s3 + $0x6f8] sm:$0xff]  ;;  %v6290_v15 = vld [vmem:[%s7974_s3 + $0x5a8] sm:$0xff] }
 0x1ae   :  { %3371 = vmatpush.bf16.msra.mxu1 %v6259_v4  ;;  %3461 = vmatpush.bf16.msra.mxu0 %v6273_v45  ;;  %v1866_v47 = vpop.f32.mrf.mxu0 }
 0x1b0   :  { %3626 = vmatpush.bf16.msrb.mxu2 %v6313_v63  ;;  %3207 = vmatpush.bf16.msra.mxu3 %v6218_v32  ;;  %v6351_v63 = vld [vmem:[%s7974_s3 + $0x790] sm:$0xff]  ;;  %v3565_v32 = vrot.slane %v7247_v28, 2 }
 0x1b2   :  { %3372 = vmatpush.bf16.msra.mxu1 %v6258_v37  ;;  %3462 = vmatpush.bf16.msra.mxu0 %v6272_v17  ;;  %v1879_v12 = vpop.f32.mrf.mxu2  ;;  %v6346_v37 = vld [vmem:[%s7974_s3 + $0x768] sm:$0xff] }
 0x1b3   :  { %v1490_v55 = vpop.f32.mrf.mxu3  ;;  %v6368_v12 = vld [vmem:[%s7974_s3 + $0x818] sm:$0xff] }
 0x1b4   :  { %3627 = vmatpush.bf16.msrb.mxu2 %v6312_v22  ;;  %3208 = vmatpush.bf16.msra.mxu3 %v6217_v60  ;;  %v6386_v22 = vld [vmem:[%s7974_s3 + $0x8a8] sm:$0xff]  ;;  %v6345_v60 = vld [vmem:[%s7974_s3 + $0x760] sm:$0xff]  ;;  %v3735_v55 = vrot.slane %v7311_v16, 2 }
 0x1b5   :  { %5707 = vmatmul.msk.bf16.vlgmr.msrb.gmra.mxu1 %vm719_vm1, %v7106_v62  ;;  %v6255_v62 = vld [vmem:[%s7974_s3 + $0x490] sm:$0xff] }
 0x1b6   :  { %3373 = vmatpush.bf16.msra.mxu1 %v6257_v3  ;;  %3463 = vmatpush.bf16.msra.mxu0 %v6271_v10  ;;  %v1740_v39 = vpop.f32.mrf.mxu1  ;;  %v2129_v21 = vpop.f32.mrf.mxu0  ;;  %v6385_v3 = vld [vmem:[%s7974_s3 + $0x8a0] sm:$0xff] }
 0x1b7   :  { %3209 = vmatmul.bf16.vlgmr.msra.gmra.mxu3 %v7114_v7  ;;  %5818 = vmatmul.msk.bf16.vlgmr.msra.gmra.mxu2 %vm719_vm1, %v3397_v18  ;;  %v6295_v7 = vld [vmem:[%s7974_s3 + $0x5d0] sm:$0xff]  ;;  %v6384_v18 = vld [vmem:[%s7974_s3 + $0x898] sm:$0xff] }
 0x1b8   :  { %3628 = vmatpush.bf16.msrb.mxu2 %v6311_v0  ;;  %3390 = vmatpush.bf16.msrb.mxu3 %v6261_v52  ;;  %v6344_v52 = vld [vmem:[%s7974_s3 + $0x758] sm:$0xff] }
 0x1b9   :  { %3464 = vmatmul.bf16.vlgmr.msra.gmra.mxu0 %v3396_v33  ;;  %v6343_v33 = vld [vmem:[%s7974_s3 + $0x750] sm:$0xff] }
 0x1ba   :  { %3645 = vmatpush.bf16.msrb.mxu0 %v6315_v20  ;;  %3374 = vmatpush.bf16.msra.mxu1 %v6256_v29  ;;  %v6289_v20 = vld [vmem:[%s7974_s3 + $0x5a0] sm:$0xff] }
 0x1bb   :  { %v1753_v9 = vpop.f32.mrf.mxu3  ;;  %v6329_v29 = vld [vmem:[%s7974_s3 + $0x6e0] sm:$0xff] }
 0x1bc   :  { %3539 = vmatpush.bf16.msra.mxu3 %v6296_v5  ;;  %3629 = vmatpush.bf16.msrb.mxu2 %v6310_v13  ;;  %v7770_v61 = vadd.f32 %v1753_v9, %v1740_v39  ;;  %v6383_v5 = vld [vmem:[%s7974_s3 + $0x890] sm:$0xff]  ;;  %v3734_v39 = vrot.slane %v7319_v40, 2 }
 0x1be   :  { %3794 = vmatpush.bf16.msra.mxu0 %v6350_v38  ;;  %3375 = vmatpush.bf16.msra.mxu1 %v6255_v62  ;;  %v2116_v11 = vpop.f32.mrf.mxu2  ;;  %v1742_v45 = vpop.f32.mrf.mxu1 }
 0x1bf   :  { %v7775_v4 = vadd.f32 %v2129_v21, %v2116_v11  ;;  %v2131_v17 = vpop.f32.mrf.mxu0  ;;  %v6381_v21 = vld [vmem:[%s7974_s3 + $0x880] sm:$0xff]  ;;  %v6380_v11 = vld [vmem:[%s7974_s3 + $0x878] sm:$0xff] }
 0x1c0   :  { %3540 = vmatpush.bf16.msra.mxu3 %v6295_v7  ;;  %3630 = vmatpush.bf16.msrb.mxu2 %v6309_v51  ;;  %v6333_v51 = vld [vmem:[%s7974_s3 + $0x700] sm:$0xff] }
 0x1c1   :  { %v6365_v45 = vld [vmem:[%s7974_s3 + $0x800] sm:$0xff] }
 0x1c2   :  { %3795 = vmatpush.bf16.msra.mxu0 %v6349_v27  ;;  %3376 = vmatpush.bf16.msra.mxu1 %v6254_v31  ;;  %v6328_v27 = vld [vmem:[%s7974_s3 + $0x6d8] sm:$0xff] }
 0x1c3   :  { %v1755_v50 = vpop.f32.mrf.mxu3 }
 0x1c4   :  { %3541 = vmatpush.bf16.msra.mxu3 %v6294_v23  ;;  %3631 = vmatpush.bf16.msrb.mxu2 %v6308_v6  ;;  %v6382_v23 = vld [vmem:[%s7974_s3 + $0x888] sm:$0xff]  ;;  %v6387_v6 = vld [vmem:[%s7974_s3 + $0x8b0] sm:$0xff]  ;;  %v3904_v50 = vrot.slane %v7379_v57, 2 }
 0x1c6   :  { %3796 = vmatpush.bf16.msra.mxu0 %v6348_v19  ;;  %3377 = vmatpush.bf16.msra.mxu1 %v6253_v24  ;;  %v2118_v10 = vpop.f32.mrf.mxu2  ;;  %v2005_v0 = vpop.f32.mrf.mxu1  ;;  %v6367_v19 = vld [vmem:[%s7974_s3 + $0x810] sm:$0xff] }
 0x1c7   :  { %5781 = vmatmul.msk.bf16.vlgmr.msrb.gmra.mxu3 %vm719_vm1, %v7179_v46  ;;  %v6291_v46 = vld [vmem:[%s7974_s3 + $0x5b0] sm:$0xff] }
 0x1c8   :  { %3542 = vmatpush.bf16.msra.mxu3 %v6293_v2  ;;  %3632 = vmatpush.bf16.msrb.mxu2 %v6307_v8  ;;  %v6326_v2 = vld [vmem:[%s7974_s3 + $0x6c8] sm:$0xff] }
 0x1c9   :  { %3378 = vmatmul.bf16.vlgmr.msra.gmra.mxu1 %v7187_v49  ;;  %5892 = vmatmul.msk.bf16.vlgmr.msrb.gmra.mxu0 %vm719_vm1, %v3566_v48  ;;  %v6331_v49 = vld [vmem:[%s7974_s3 + $0x6f0] sm:$0xff]  ;;  %v6366_v8 = vld [vmem:[%s7974_s3 + $0x808] sm:$0xff] }
 0x1ca   :  { %3797 = vmatpush.bf16.msra.mxu0 %v6347_v25  ;;  %3559 = vmatpush.bf16.msrb.mxu1 %v6297_v14  ;;  %v2368_v41 = vpop.f32.mrf.mxu0  ;;  %v6325_v14 = vld [vmem:[%s7974_s3 + $0x6c0] sm:$0xff]  ;;  %v6379_v48 = vld [vmem:[%s7974_s3 + $0x870] sm:$0xff] }
 0x1cb   :  { %3633 = vmatmul.bf16.vlgmr.msrb.gmra.mxu2 %v3565_v32 }
 0x1cc   :  { %3814 = vmatpush.bf16.msra.mxu2 %v6351_v63  ;;  %3543 = vmatpush.bf16.msra.mxu3 %v6292_v30  ;;  %v6369_v30 = vld [vmem:[%s7974_s3 + $0x820] sm:$0xff] }
 0x1ce   :  { %3708 = vmatpush.bf16.msra.mxu1 %v6332_v34  ;;  %3798 = vmatpush.bf16.msra.mxu0 %v6346_v37  ;;  %v1992_v13 = vpop.f32.mrf.mxu3  ;;  %v2381_v47 = vpop.f32.mrf.mxu2  ;;  %v6364_v37 = vld [vmem:[%s7974_s3 + $0x7f8] sm:$0xff] }
 0x1cf   :  { %v7834_v38 = vadd.f32 %v2005_v0, %v1992_v13  ;;  %v7836_v62 = vadd.f32 %v2381_v47, %v2368_v41  ;;  %v2007_v7 = vpop.f32.mrf.mxu1  ;;  %v6362_v0 = vld [vmem:[%s7974_s3 + $0x7e8] sm:$0xff] }
 0x1d0   :  { %3963 = vmatpush.bf16.msrb.mxu2 %v6386_v22  ;;  %3544 = vmatpush.bf16.msra.mxu3 %v6291_v46 }
 0x1d2   :  { %3709 = vmatpush.bf16.msra.mxu1 %v6331_v49  ;;  %3799 = vmatpush.bf16.msra.mxu0 %v6345_v60  ;;  %v2370_v31 = vpop.f32.mrf.mxu0  ;;  %v3903_v49 = vrot.slane %v7387_v44, 2  ;;  %v6363_v60 = vld [vmem:[%s7974_s3 + $0x7f0] sm:$0xff] }
 0x1d4   :  { %3964 = vmatpush.bf16.msrb.mxu2 %v6385_v3  ;;  %3545 = vmatpush.bf16.msra.mxu3 %v6290_v15 }
 0x1d6   :  { %3710 = vmatpush.bf16.msra.mxu1 %v6330_v56  ;;  %3800 = vmatpush.bf16.msra.mxu0 %v6344_v52  ;;  %v2383_v24 = vpop.f32.mrf.mxu2 }
 0x1d8   :  { %3965 = vmatpush.bf16.msrb.mxu2 %v6384_v18  ;;  %3546 = vmatpush.bf16.msra.mxu3 %v6289_v20 }
 0x1d9   :  { %5855 = vmatmul.msk.bf16.vlgmr.msrb.gmra.mxu1 %vm719_vm1, %v7252_v35  ;;  %v6327_v35 = vld [vmem:[%s7974_s3 + $0x6d0] sm:$0xff] }
 0x1da   :  { %3711 = vmatpush.bf16.msra.mxu1 %v6329_v29  ;;  %3801 = vmatpush.bf16.msra.mxu0 %v6343_v33  ;;  %v2244_v9 = vpop.f32.mrf.mxu1  ;;  %v2633_v25 = vpop.f32.mrf.mxu0 }
 0x1db   :  { %3547 = vmatmul.bf16.vlgmr.msra.gmra.mxu3 %v7247_v28  ;;  %5966 = vmatmul.msk.bf16.vlgmr.msra.gmra.mxu2 %vm719_vm1, %v3735_v55  ;;  %v1994_v28 = vpop.f32.mrf.mxu3 }
 0x1dc   :  { %3966 = vmatpush.bf16.msrb.mxu2 %v6383_v5  ;;  %3728 = vmatpush.bf16.msrb.mxu3 %v6333_v51 }
 0x1dd   :  { %3802 = vmatmul.bf16.vlgmr.msra.gmra.mxu0 %v3734_v39 }
 0x1de   :  { %3712 = vmatpush.bf16.msra.mxu1 %v6328_v27  ;;  %3983 = vmatpush.bf16.msrb.mxu0 %v6387_v6 }
 0x1e0   :  { %3877 = vmatpush.bf16.msra.mxu3 %v6368_v12  ;;  %3967 = vmatpush.bf16.msrb.mxu2 %v6382_v23 }
 0x1e2   :  { %3713 = vmatpush.bf16.msra.mxu1 %v6327_v35  ;;  %v2620_v34 = vpop.f32.mrf.mxu2  ;;  %v2246_v22 = vpop.f32.mrf.mxu1 }
 0x1e3   :  { %v2257_v63 = vpop.f32.mrf.mxu3  ;;  %v7894_v17 = vadd.f32 %v2633_v25, %v2620_v34  ;;  %v2635_v46 = vpop.f32.mrf.mxu0 }
 0x1e4   :  { %3878 = vmatpush.bf16.msra.mxu3 %v6367_v19  ;;  %3968 = vmatpush.bf16.msrb.mxu2 %v6381_v21  ;;  %v7889_v32 = vadd.f32 %v2257_v63, %v2244_v9 }
 0x1e6   :  { %3714 = vmatpush.bf16.msra.mxu1 %v6326_v2 }
 0x1e8   :  { %3879 = vmatpush.bf16.msra.mxu3 %v6366_v8  ;;  %3969 = vmatpush.bf16.msrb.mxu2 %v6380_v11 }
 0x1ea   :  { %3715 = vmatpush.bf16.msra.mxu1 %v6325_v14  ;;  %v2622_v10 = vpop.f32.mrf.mxu2 }
 0x1eb   :  { %5929 = vmatmul.msk.bf16.vlgmr.msrb.gmra.mxu3 %vm719_vm1, %v7311_v16  ;;  %v2259_v3 = vpop.f32.mrf.mxu3  ;;  %v2509_v16 = vpop.f32.mrf.mxu1 }
 0x1ec   :  { %3880 = vmatpush.bf16.msra.mxu3 %v6365_v45  ;;  %3970 = vmatpush.bf16.msrb.mxu2 %v6379_v48 }
 0x1ed   :  { %3716 = vmatmul.bf16.vlgmr.msra.gmra.mxu1 %v7319_v40  ;;  %6040 = vmatmul.msk.bf16.vlgmr.msrb.gmra.mxu0 %vm719_vm1, %v3904_v50  ;;  %v6361_v40 = vld [vmem:[%s7974_s3 + $0x7e0] sm:$0xff] }
 0x1ee   :  { %3897 = vmatpush.bf16.msrb.mxu1 %v6369_v30  ;;  %v2789_v15 = vpop.f32.mrf.mxu0 }
 0x1ef   :  { %3971 = vmatmul.bf16.vlgmr.msrb.gmra.mxu2 %v3903_v49  ;;  %v2790_v56 = vadd.f32 %v2789_v15, %v7524_v54 }
 0x1f0   :  { %3881 = vmatpush.bf16.msra.mxu3 %v6364_v37 }
 0x1f2   :  { %v2802_v41 = vpop.f32.mrf.mxu2 }
 0x1f3   :  { %v2496_v52 = vpop.f32.mrf.mxu3  ;;  %v2803_v20 = vadd.f32 %v2802_v41, %v2790_v56  ;;  %v2511_v29 = vpop.f32.mrf.mxu1 }
 0x1f4   :  { %3882 = vmatpush.bf16.msra.mxu3 %v6363_v60  ;;  %v7912_v18 = vadd.f32 %v2509_v16, %v2496_v52 }
 0x1f6   :  { %v2791_v33 = vpop.f32.mrf.mxu0 }
 0x1f8   :  { %3883 = vmatpush.bf16.msra.mxu3 %v6362_v0 }
 0x1fa   :  { %v2804_v54 = vpop.f32.mrf.mxu2 }
 0x1fb   :  { %v2498_v5 = vpop.f32.mrf.mxu3 }
 0x1fc   :  { %3884 = vmatpush.bf16.msra.mxu3 %v6361_v40 }
 0x1fd   :  { %6003 = vmatmul.msk.bf16.vlgmr.msrb.gmra.mxu1 %vm719_vm1, %v7379_v57 }
 0x1fe   :  { %v2703_v13 = vpop.f32.mrf.mxu1  ;;  %v2971_v47 = vpop.f32.mrf.mxu0 }
 0x1ff   :  { %3885 = vmatmul.bf16.vlgmr.msra.gmra.mxu3 %v7387_v44  ;;  %v2704_v7 = vadd.f32 %v2703_v13, %v7500_v36 }
 0x203   :  { %v2716_v51 = vpop.f32.mrf.mxu3 }
 0x204   :  { %v2717_v55 = vadd.f32 %v2716_v51, %v2704_v7 }
 0x206   :  { %v2958_v27 = vpop.f32.mrf.mxu2  ;;  %v3989_v12 = vadd.f32 %v2803_v20, %v2717_v55  ;;  %v2705_v39 = vpop.f32.mrf.mxu1 }
 0x207   :  { %v2959_v31 = vadd.f32 %v2958_v27, %v7581_v43  ;;  %v2973_v23 = vpop.f32.mrf.mxu0 }
 0x209   :  { %v2972_v6 = vadd.f32 %v2971_v47, %v2959_v31  ;;  %v6404_v31 = vld [vmem:[%s7976_s5 + $0x38] sm:$0xff] }
 0x20a   :  { %4079 = vmatpush.bf16.msra.mxu1 %v6404_v31 }
 0x20b   :  { %v2718_v35 = vpop.f32.mrf.mxu3 }
 0x20e   :  { %v2960_v44 = vpop.f32.mrf.mxu2  ;;  %v2885_v19 = vpop.f32.mrf.mxu1 }
 0x20f   :  { %v6402_v44 = vld [vmem:[%s7976_s5 + $0x28] sm:$0xff] }
 0x212   :  { %v3127_v21 = vpop.f32.mrf.mxu0 }
 0x213   :  { %v3128_v57 = vadd.f32 %v3127_v21, %v7590_v59 }
 0x216   :  { %v2872_v28 = vpop.f32.mrf.mxu3  ;;  %v3140_v24 = vpop.f32.mrf.mxu2 }
 0x217   :  { %v2873_v2 = vadd.f32 %v2872_v28, %v7564_v58  ;;  %v3141_v36 = vadd.f32 %v3140_v24, %v3128_v57  ;;  %v2887_v8 = vpop.f32.mrf.mxu1  ;;  %v6401_v28 = vld [vmem:[%s7976_s5 + $0x20] sm:$0xff] }
 0x219   :  { %v2886_v9 = vadd.f32 %v2885_v19, %v2873_v2 }
 0x21a   :  { %v3129_v25 = vpop.f32.mrf.mxu0 }
 0x21b   :  { %v3990_v11 = vadd.f32 %v2972_v6, %v2886_v9  ;;  %v6403_v6 = vld [vmem:[%s7976_s5 + $0x30] sm:$0xff]  ;;  %v6400_v25 = vld [vmem:[%s7976_s5 + $0x18] sm:$0xff] }
 0x21c   :  { %4080 = vmatpush.bf16.msra.mxu1 %v6403_v6 }
 0x21d   :  { %v3997_v14 = vadd.f32 %v3990_v11, %v3989_v12 }
 0x21e   :  { %v2874_v43 = vpop.f32.mrf.mxu3  ;;  %v3142_v45 = vpop.f32.mrf.mxu2 }
 0x21f   :  { %v6399_v45 = vld [vmem:[%s7976_s5 + $0x10] sm:$0xff] }
 0x220   :  { %4081 = vmatpush.bf16.msra.mxu1 %v6402_v44 }
 0x222   :  { %v3041_v48 = vpop.f32.mrf.mxu1  ;;  %v3309_v63 = vpop.f32.mrf.mxu0 }
 0x223   :  { %v3042_v30 = vadd.f32 %v3041_v48, %v7642_v42 }
 0x224   :  { %4082 = vmatpush.bf16.msra.mxu1 %v6401_v28 }
 0x226   :  { %v3054_v34 = vpop.f32.mrf.mxu3 }
 0x227   :  { %v3055_v37 = vadd.f32 %v3054_v34, %v3042_v30  ;;  %v6397_v30 = vld [vmem:[%s7976_s5] sm:$0xff] }
 0x228   :  { %4083 = vmatpush.bf16.msra.mxu1 %v6400_v25 }
 0x229   :  { %v3991_v59 = vadd.f32 %v3141_v36, %v3055_v37 }
 0x22a   :  { %v3296_v22 = vpop.f32.mrf.mxu2  ;;  %v3043_v50 = vpop.f32.mrf.mxu1 }
 0x22b   :  { %v3297_v46 = vadd.f32 %v3296_v22, %v7654_v26  ;;  %v3311_v58 = vpop.f32.mrf.mxu0 }
 0x22c   :  { %4084 = vmatpush.bf16.msra.mxu1 %v6399_v45 }
 0x22d   :  { %v3310_v49 = vadd.f32 %v3309_v63, %v3297_v46  ;;  %v6398_v63 = vld [vmem:[%s7976_s5 + $0x8] sm:$0xff] }
 0x22e   :  { %v3056_v60 = vpop.f32.mrf.mxu3 }
 0x230   :  { %4085 = vmatpush.bf16.msra.mxu1 %v6398_v63 }
 0x232   :  { %v3298_v3 = vpop.f32.mrf.mxu2  ;;  %v3223_v10 = vpop.f32.mrf.mxu1 }
 0x234   :  { %4086 = vmatpush.bf16.msra.mxu1 %v6397_v30 }
 0x236   :  { %v3465_v0 = vpop.f32.mrf.mxu0 }
 0x237   :  { %v3466_v16 = vadd.f32 %v3465_v0, %v7711_v1 }
 0x23a   :  { %v3210_v15 = vpop.f32.mrf.mxu3  ;;  %v3478_v56 = vpop.f32.mrf.mxu2 }
 0x23b   :  { %v3211_v40 = vadd.f32 %v3210_v15, %v7706_v53  ;;  %v3479_v42 = vadd.f32 %v3478_v56, %v3466_v16  ;;  %v3225_v52 = vpop.f32.mrf.mxu1 }
 0x23d   :  { %v3224_v41 = vadd.f32 %v3223_v10, %v3211_v40 }
 0x23e   :  { %v3467_v20 = vpop.f32.mrf.mxu0 }
 0x23f   :  { %v3992_v29 = vadd.f32 %v3310_v49, %v3224_v41 }
 0x241   :  { %v3998_v33 = vadd.f32 %v3992_v29, %v3991_v59  ;;  %v6414_v29 = vld [vmem:[%s7975_s4] ss:$0 sm:$0xff]  ;;  %s6447_s4 = smov [#allocation2]  }
 0x242   :  { %v3212_v26 = vpop.f32.mrf.mxu3  ;;  %v3480_v5 = vpop.f32.mrf.mxu2 }
 0x243   :  { %v7925_v54 = vadd.f32 %v3998_v33, %v3997_v14 }
 0x246   :  { %v3379_v13 = vpop.f32.mrf.mxu1  ;;  %v3647_v47 = vpop.f32.mrf.mxu0 }
 0x247   :  { %v3380_v7 = vadd.f32 %v3379_v13, %v7770_v61 }
 0x24a   :  { %v3392_v51 = vpop.f32.mrf.mxu3 }
 0x24b   :  { %v3393_v1 = vadd.f32 %v3392_v51, %v3380_v7 }
 0x24d   :  { %v3993_v27 = vadd.f32 %v3479_v42, %v3393_v1 }
 0x24e   :  { %v3634_v55 = vpop.f32.mrf.mxu2  ;;  %v3381_v12 = vpop.f32.mrf.mxu1 }
 0x24f   :  { %v3649_v53 = vpop.f32.mrf.mxu0  ;;  %v3635_v19 = vadd.f32 %v3634_v55, %v7775_v4 }
 0x251   :  { %v3648_v36 = vadd.f32 %v3647_v47, %v3635_v19 }
 0x252   :  { %v3394_v39 = vpop.f32.mrf.mxu3 }
 0x256   :  { %v3636_v23 = vpop.f32.mrf.mxu2  ;;  %v3561_v35 = vpop.f32.mrf.mxu1 }
 0x25a   :  { %v3803_v61 = vpop.f32.mrf.mxu0 }
 0x25b   :  { %v3804_v34 = vadd.f32 %v3803_v61, %v7836_v62 }
 0x25e   :  { %v3548_v21 = vpop.f32.mrf.mxu3  ;;  %v3816_v57 = vpop.f32.mrf.mxu2 }
 0x25f   :  { %v3549_v24 = vadd.f32 %v3548_v21, %v7834_v38  ;;  %v3563_v2 = vpop.f32.mrf.mxu1  ;;  %v3817_v59 = vadd.f32 %v3816_v57, %v3804_v34 }
 0x261   :  { %v3562_v8 = vadd.f32 %v3561_v35, %v3549_v24 }
 0x262   :  { %v3805_v9 = vpop.f32.mrf.mxu0 }
 0x263   :  { %v3994_v11 = vadd.f32 %v3648_v36, %v3562_v8 }
 0x265   :  { %v3999_v4 = vadd.f32 %v3994_v11, %v3993_v27 }
 0x266   :  { %v3550_v14 = vpop.f32.mrf.mxu3  ;;  %v3818_v43 = vpop.f32.mrf.mxu2 }
 0x26a   :  { %v3717_v38 = vpop.f32.mrf.mxu1  ;;  %v3985_v48 = vpop.f32.mrf.mxu0 }
 0x26b   :  { %v3718_v37 = vadd.f32 %v3717_v38, %v7889_v32 }
 0x26e   :  { %v3730_v22 = vpop.f32.mrf.mxu3 }
 0x26f   :  { %v3731_v46 = vadd.f32 %v3730_v22, %v3718_v37 }
 0x271   :  { %v3995_v58 = vadd.f32 %v3817_v59, %v3731_v46 }
 0x272   :  { %v3972_v50 = vpop.f32.mrf.mxu2  ;;  %v3719_v49 = vpop.f32.mrf.mxu1 }
 0x273   :  { %v3987_v60 = vpop.f32.mrf.mxu0  ;;  %v3973_v16 = vadd.f32 %v3972_v50, %v7894_v17  ;;  %v6415_v17 = vld [vmem:[%s7977_s6] ss:$0 sm:$0xff]  ;;  %s4112_s6 = sshll.u32 %s6447_s4, 4  ;;  %s4113_s6 = int_to_ptr.vmem [resolvable:$true] %s4112_s6 }
 0x275   :  { %v3986_v62 = vadd.f32 %v3985_v48, %v3973_v16 }
 0x276   :  { %v3732_v3 = vpop.f32.mrf.mxu3 }
 0x27a   :  { %v3974_v10 = vpop.f32.mrf.mxu2  ;;  %v3899_v0 = vpop.f32.mrf.mxu1 }
 0x282   :  { %v3886_v15 = vpop.f32.mrf.mxu3  ;;  %v3901_v40 = vpop.f32.mrf.mxu1 }
 0x283   :  { %v3887_v56 = vadd.f32 %v3886_v15, %v7912_v18 }
 0x285   :  { %v3900_v42 = vadd.f32 %v3899_v0, %v3887_v56 }
 0x287   :  { %v3996_v32 = vadd.f32 %v3986_v62, %v3900_v42 }
 0x289   :  { %v4000_v52 = vadd.f32 %v3996_v32, %v3995_v58 }
 0x28a   :  { %v3888_v41 = vpop.f32.mrf.mxu3 }
 0x28b   :  { %v4002_v20 = vadd.f32 %v4000_v52, %v3999_v4 }
 0x28d   :  { %v4003_v33 = vadd.f32 %v4002_v20, %v7925_v54 }
 0x28f   :  { %v4008_v26 = vadd.f32 %v6414_v29, %v4003_v33 }
 0x291   :  { %v4009_v5 = vmax.f32 %v4008_v26, 0.0 }
 0x293   :  { %v4010_v13 = vpack.c.bf16 %v4009_v5, %v4009_v5 }
 0x295   :  { %4087 = vmatmul.bf16.vlgmr.msra.gmra.mxu1 %v4010_v13 }
 0x312   :  { %v4088_v18 = vpop.f32.mrf.mxu1 }
 0x313   :  { %v4089_v47 = vadd.f32 %v6415_v17, %v4088_v18 }
 0x315   :  { %v4093_v7 = vsel %vm4092_vm2, %v4089_v47, -inf }
 0x316   :  { %4094 = vmax.xlane.f32.xlu2 %v4093_v7 }
 0x31a   :  { %v4090_v51 = vpop.f32.mrf.mxu1 }
 0x389   :  { %v4095_v1 = vpop.xlane.xlu2 %4094 }
 0x38a   :  { %v4096_v55 = vsub.f32 %v4089_v47, %v4095_v1 }
 0x38c   :  { %v4097_v27 = vmul.f32 1.442695, %v4096_v55 }
 0x38e   :  { %6416 = vpow2.f32 %v4097_v27 }
 0x394   :  { %v6417_v54 = vpop.eup %6416 }
 0x395   :  { %v4099_v12 = vsel %vm4092_vm2, %v6417_v54, 0.0 }
 0x396   :  { %4100 = vadd.xlane.f32.xlu0 %v4099_v12 }
 0x409   :  { %v4101_v53 = vpop.xlane.xlu0 %4100 }
 0x40a   :  { %6418 = vlog2.f32 %v4101_v53 }
 0x410   :  { %v6419_v31 = vpop.eup %6418 }
 0x411   :  { %v4103_v39 = vmul.f32 0.6931472, %v6419_v31 }
 0x413   :  { %v4104_v23 = vadd.f32 %v4103_v39, %v4095_v1 }
 0x415   :  { %v4105_v6 = vsub.f32 %v4089_v47, %v4104_v23 }
 0x417   :  { %4106 = vst.msk [vmem:[#allocation2] sm:$0x3] %vm4092_vm2, %v4105_v6 }
 0x418   :  { %4117 = dma.vmem_to_hbm [thread:$0]  %s4113_s6, 32, %s4115_s11, [#allocation3]  }
 0x419   :  { %6444 = dma.done.wait [#allocation3], 32  }
 0x41a   :  { %6445 = vsyncadd [#allocation3], 4294967264 }
 0x41b   :  { %4122 = vsyncpa [#allocation3], 1 }

</bundles_post_ra>
